<compile_context>
chip_gen: v7x
topology: tpu7x:2x2x1
jax: 0.10.0
libtpu: 0.0.40
codegen_flags: <defaults>
</compile_context>

<pallas_src>
import functools

import jax
import jax.numpy as jnp
import numpy as np
from jax import lax
from jax.experimental import pallas as pl
from jax.experimental.pallas import tpu as pltpu

EPS = 1e-5
_VMEM_CAP = 48 * 2**20          # leave headroom under v7x's 64 MiB per-core VMEM


def _round_up(x, m):
    return (x + m - 1) // m * m


def _vmem_limit(need_bytes):
    # exact tile accounting + 25% / 2 MiB headroom for Mosaic internal scratch
    return int(min(_VMEM_CAP, max(4 * 2**20, int(need_bytes * 1.25) + (2 << 20))))


# --------------------------------------------------------------------------- #
# Pass 1: K-tiled GEMM (bf16 in, f32 acc) + per-tile BN partial stats.
# --------------------------------------------------------------------------- #
def _store_stats(conv_f32, stats_ref):
    # two direct sub-stores (no concat / relayout on the tiny stats tile)
    stats_ref[0:1, :] = jnp.sum(conv_f32, axis=0, keepdims=True)
    stats_ref[1:2, :] = jnp.sum(conv_f32 * conv_f32, axis=0, keepdims=True)


def _gemm_stats_kernel(p_ref, w_ref, stats_ref, acc_ref):
    k = pl.program_id(2)

    @pl.when(k == 0)
    def _():
        acc_ref[...] = jnp.zeros_like(acc_ref)

    acc_ref[...] += jnp.dot(p_ref[...], w_ref[...],
                            preferred_element_type=jnp.float32)

    @pl.when(k == pl.num_programs(2) - 1)
    def _():
        _store_stats(acc_ref[...], stats_ref)


def _gemm_stats_conv_kernel(p_ref, w_ref, stats_ref, conv_ref, acc_ref):
    k = pl.program_id(2)

    @pl.when(k == 0)
    def _():
        acc_ref[...] = jnp.zeros_like(acc_ref)

    acc_ref[...] += jnp.dot(p_ref[...], w_ref[...],
                            preferred_element_type=jnp.float32)

    @pl.when(k == pl.num_programs(2) - 1)
    def _():
        acc = acc_ref[...]
        _store_stats(acc, stats_ref)
        conv_ref[...] = acc.astype(conv_ref.dtype)      # bf16 intermediate


# --------------------------------------------------------------------------- #
# Pass 2a (recompute): GEMM again, fuse y = conv*scale + shift, store transposed.
# --------------------------------------------------------------------------- #
def _gemm_norm_kernel(p_ref, w_ref, scale_ref, shift_ref, o_ref, acc_ref):
    k = pl.program_id(2)

    @pl.when(k == 0)
    def _():
        acc_ref[...] = jnp.zeros_like(acc_ref)

    acc_ref[...] += jnp.dot(p_ref[...], w_ref[...],
                            preferred_element_type=jnp.float32)

    @pl.when(k == pl.num_programs(2) - 1)
    def _():
        y = acc_ref[...] * scale_ref[...] + shift_ref[...]     # (tsp, C_pad)
        o_ref[...] = y.T.astype(o_ref.dtype)                   # (C_pad, tsp) lane-dense


# --------------------------------------------------------------------------- #
# Pass 2b (bf16 intermediate): fused scale/shift, store transposed.
# --------------------------------------------------------------------------- #
def _norm_kernel(conv_ref, scale_ref, shift_ref, o_ref):
    y = conv_ref[...].astype(jnp.float32) * scale_ref[...] + shift_ref[...]
    o_ref[...] = y.T.astype(o_ref.dtype)


# --------------------------------------------------------------------------- #
# Wrapper
# --------------------------------------------------------------------------- #
def unet_down_block(x_ncdhw, w_oidhw, b, gamma, beta, *, tsp=1024, tk=512):
    """x: (N, Cin, D, H, W); w: (Cout, Cin, 3, 3, 3). Returns (N, Cout, OD, OH, OW)."""
    del b   # conv bias is exactly cancelled by the BN mean subtraction
    N, Cin, D, H, W = x_ncdhw.shape
    Cout = w_oidhw.shape[0]
    OD, OH, OW = (D - 1) // 2 + 1, (H - 1) // 2 + 1, (W - 1) // 2 + 1
    Msp = OD * OH * OW                       # output positions per batch element
    K = 27 * Cin

    # MXU/lane-friendly padding: 128 for small channel counts, 256-aligned when
    # Cout is big enough to feed v6e/v7x's 256-wide MXU.
    C_pad = _round_up(Cout, 128) if Cout <= 128 else _round_up(Cout, 256)
    tk = max(128, _round_up(min(tk, _round_up(K, 128)), 128))
    K_pad = _round_up(K, tk)
    n_k = K_pad // tk
    tsp = max(128, min(_round_up(tsp, 128), _round_up(Msp, 128)))
    Msp_pad = _round_up(Msp, tsp)
    n_sp = Msp_pad // tsp

    # ------- layout glue in XLA: channels-last, spatial pad, bf16 im2col -------
    # TODO(synk): stream these 27 taps from HBM inside the kernel instead of
    # materializing the (N, Msp, K) im2col.
    x = jnp.transpose(x_ncdhw, (0, 2, 3, 4, 1))                    # (N,D,H,W,Cin)
    xp = jnp.pad(x, ((0, 0), (1, 1), (1, 1), (1, 1), (0, 0)))
    taps = [xp[:, kd:kd + 2 * OD:2, kh:kh + 2 * OH:2, kw:kw + 2 * OW:2, :]
            for kd in range(3) for kh in range(3) for kw in range(3)]
    patches = jnp.stack(taps, axis=-2).reshape(N, Msp, K)
    patches = jnp.pad(patches, ((0, 0), (0, Msp_pad - Msp), (0, K_pad - K)))
    patches = patches.astype(jnp.bfloat16)

    # weights: (Cout,Cin,kd,kh,kw) -> (kd,kh,kw,Cin,Cout) -> (K_pad, C_pad) bf16
    w_mat = jnp.transpose(w_oidhw, (2, 3, 4, 1, 0)).reshape(K, Cout)
    w_mat = jnp.pad(w_mat, ((0, K_pad - K), (0, C_pad - Cout))).astype(jnp.bfloat16)

    # ------------------------------ specs / grid ------------------------------
    grid = (N, n_sp, n_k)
    dimsem = ("parallel", "parallel", "arbitrary")      # v7x megacore shards b,i
    p_spec = pl.BlockSpec((None, tsp, tk), lambda b, i, k: (b, i, k))
    w_spec = pl.BlockSpec((tk, C_pad), lambda b, i, k: (k, 0))
    stats_spec = pl.BlockSpec((None, None, 2, C_pad), lambda b, i, k: (b, i, 0, 0))
    conv_spec = pl.BlockSpec((None, tsp, C_pad), lambda b, i, k: (b, i, 0))
    out_spec = pl.BlockSpec((None, C_pad, tsp), lambda b, i, k: (b, 0, i))
    vec_spec = pl.BlockSpec((1, C_pad), lambda b, i, k: (0, 0))
    acc_scratch = pltpu.VMEM((tsp, C_pad), jnp.float32)

    # Recompute the GEMM in pass 2 when re-reading the bf16 patches (2*K_pad B/row)
    # is cheaper than write+read of a bf16 conv intermediate (4*C_pad B/row).
    recompute = (2 * K_pad) <= (4 * C_pad)

    stats_shape = jax.ShapeDtypeStruct((N, n_sp, 2, C_pad), jnp.float32)
    conv_shape = jax.ShapeDtypeStruct((N, Msp_pad, C_pad), jnp.bfloat16)
    common_bytes = (2 * tsp * tk * 2 + 2 * tk * C_pad * 2      # patches + weights (x2 buf)
                    + tsp * C_pad * 4                          # f32 accumulator
                    + 2 * 2 * C_pad * 4)                       # stats tile (x2 buf)

    # ---------------------- pass 1: GEMM + partial BN stats ----------------------
    if recompute:
        part_stats = pl.pallas_call(
            _gemm_stats_kernel,
            out_shape=stats_shape,
            grid_spec=pltpu.PrefetchScalarGridSpec(
                num_scalar_prefetch=0, grid=grid,
                in_specs=[p_spec, w_spec],
                out_specs=stats_spec,
                scratch_shapes=[acc_scratch]),
            compiler_params=pltpu.CompilerParams(
                dimension_semantics=dimsem,
                vmem_limit_bytes=_vmem_limit(common_bytes)),
        )(patches, w_mat)
        conv_bf16 = None
    else:
        part_stats, conv_bf16 = pl.pallas_call(
            _gemm_stats_conv_kernel,
            out_shape=(stats_shape, conv_shape),
            grid_spec=pltpu.PrefetchScalarGridSpec(
                num_scalar_prefetch=0, grid=grid,
                in_specs=[p_spec, w_spec],
                out_specs=[stats_spec, conv_spec],
                scratch_shapes=[acc_scratch]),
            compiler_params=pltpu.CompilerParams(
                dimension_semantics=dimsem,
                vmem_limit_bytes=_vmem_limit(common_bytes + 2 * tsp * C_pad * 2)),
        )(patches, w_mat)

    # ------- tiny stats reduction + fold gamma/beta/rsqrt into scale/shift -------
    count = float(N * Msp)                     # padded rows/lanes contribute zeros
    tot = jnp.sum(part_stats, axis=(0, 1))     # (2, C_pad)
    mean = tot[0] / count
    # TODO(synk): E[x^2]-E[x]^2 in f32 can cancel for very large M / offset-heavy
    # activations; switch to per-tile mean-shifted partials if that regime matters.
    var = jnp.maximum(tot[1] / count - mean * mean, 0.0)       # biased (training) var
    gamma_p = jnp.pad(gamma.astype(jnp.float32), (0, C_pad - Cout))
    beta_p = jnp.pad(beta.astype(jnp.float32), (0, C_pad - Cout))
    scale_v = gamma_p * lax.rsqrt(var + EPS)
    shift_v = beta_p - mean * scale_v
    scale = scale_v.reshape(1, C_pad)
    shift = shift_v.reshape(1, C_pad)

    # -------------------- pass 2: fused normalize (transposed) --------------------
    out_shape = jax.ShapeDtypeStruct((N, C_pad, Msp_pad), jnp.float32)
    if recompute:
        out_t = pl.pallas_call(
            _gemm_norm_kernel,
            out_shape=out_shape,
            grid_spec=pltpu.PrefetchScalarGridSpec(
                num_scalar_prefetch=0, grid=grid,
                in_specs=[p_spec, w_spec, vec_spec, vec_spec],
                out_specs=out_spec,
                scratch_shapes=[acc_scratch]),
            compiler_params=pltpu.CompilerParams(
                dimension_semantics=dimsem,
                vmem_limit_bytes=_vmem_limit(
                    common_bytes + 2 * C_pad * tsp * 4 + 2 * 2 * C_pad * 4)),
        )(patches, w_mat, scale, shift)
    else:
        out_t = pl.pallas_call(
            _norm_kernel,
            out_shape=out_shape,
            grid_spec=pltpu.PrefetchScalarGridSpec(
                num_scalar_prefetch=0, grid=(N, n_sp),
                in_specs=[pl.BlockSpec((None, tsp, C_pad), lambda b, i: (b, i, 0)),
                          pl.BlockSpec((1, C_pad), lambda b, i: (0, 0)),
                          pl.BlockSpec((1, C_pad), lambda b, i: (0, 0))],
                out_specs=pl.BlockSpec((None, C_pad, tsp), lambda b, i: (b, 0, i))),
            compiler_params=pltpu.CompilerParams(
                dimension_semantics=("parallel", "parallel"),
                vmem_limit_bytes=_vmem_limit(
                    2 * tsp * C_pad * 2 + 2 * C_pad * tsp * 4 + 2 * 2 * C_pad * 4)),
        )(conv_bf16, scale, shift)

    # (N, C_pad, Msp_pad) is already batch-major, channel-planar -> NCDHW is just a
    # slice + reshape (no channels-minor transpose pass).
    return out_t[:, :Cout, :Msp].reshape(N, Cout, OD, OH, OW)


# --------------------------------------------------------------------------- #
# Reference + self-test
# --------------------------------------------------------------------------- #
def _reference(x, w, b, gamma, beta):
    conv = lax.conv_general_dilated(
        x, w, window_strides=(2, 2, 2), padding=((1, 1), (1, 1), (1, 1)),
        dimension_numbers=("NCDHW", "OIDHW", "NCDHW"))
    conv = conv + b[None, :, None, None, None]
    mean = conv.mean(axis=(0, 2, 3, 4), keepdims=True)
    var = ((conv - mean) ** 2).mean(axis=(0, 2, 3, 4), keepdims=True)
    y = (conv - mean) / jnp.sqrt(var + EPS)
    return y * gamma[None, :, None, None, None] + beta[None, :, None, None, None]


def _run_case(key, *, N, Cin, Cout, S, **kw):
    kx, kw_, kb, kg, kbe = jax.random.split(key, 5)
    x = jax.random.normal(kx, (N, Cin, S, S, S), dtype=jnp.float32)
    bound = 1.0 / np.sqrt(Cin * 27)
    w = jax.random.uniform(kw_, (Cout, Cin, 3, 3, 3), jnp.float32, -bound, bound)
    b = jax.random.uniform(kb, (Cout,), jnp.float32, -bound, bound)
    gamma = 1.0 + 0.1 * jax.random.normal(kg, (Cout,), jnp.float32)
    beta = 0.1 * jax.random.normal(kbe, (Cout,), jnp.float32)

    fwd = jax.jit(functools.partial(unet_down_block, **kw))
    out = jax.block_until_ready(fwd(x, w, b, gamma, beta))
    ref = _reference(x, w, b, gamma, beta)
    assert out.shape == ref.shape
    # bf16 GEMM inputs (f32 accumulation) vs. f32 reference -> relaxed tolerance.
    np.testing.assert_allclose(np.asarray(out), np.asarray(ref), atol=3e-2, rtol=3e-2)


if __name__ == "__main__":
    k1, k2 = jax.random.split(jax.random.PRNGKey(0))
    # small-channel config -> recompute path (conv intermediate never touches HBM)
    _run_case(k1, N=2, Cin=4, Cout=8, S=16)
    # larger-Cin config -> bf16-intermediate path + multi-step K accumulation
    _run_case(k2, N=2, Cin=16, Cout=8, S=8, tk=256)
    print("KERNEL_OK")
</pallas_src>

<mosaic_0001>
module attributes {stable_mosaic.version = 11 : i64} {
  func.func @_gemm_stats_kernel(%arg0: i32, %arg1: i32, %arg2: i32, %arg3: memref<1x512x128xbf16, #tpu.memory_space<vmem>>, %arg4: memref<128x128xbf16, #tpu.memory_space<vmem>>, %arg5: memref<1x1x2x128xf32, #tpu.memory_space<vmem>>, %arg6: memref<512x128xf32, #tpu.memory_space<vmem>>) attributes {dimension_semantics = [#tpu.dimension_semantics<parallel>, #tpu.dimension_semantics<parallel>, #tpu.dimension_semantics<arbitrary>], iteration_bounds = array<i64: 2, 1, 1>, scalar_prefetch = 0 : i64, scratch_operands = 1 : i64, tpu.core_type = #tpu.core_type<tc>, window_params = [{transform_indices = @transform_0, window_bounds = array<i64: 1, 512, 128>}, {transform_indices = @transform_1, window_bounds = array<i64: 128, 128>}, {transform_indices = @transform_2, window_bounds = array<i64: 1, 1, 2, 128>}]} {
    %c0_i32 = arith.constant 0 : i32
    %0 = arith.cmpi eq, %arg2, %c0_i32 : i32
    %1 = arith.extui %0 : i1 to i32
    %c0_i32_0 = arith.constant 0 : i32
    %2 = arith.cmpi ne, %1, %c0_i32_0 : i32
    scf.if %2 {
      %cst_11 = arith.constant 0.000000e+00 : f32
      %13 = vector.broadcast %cst_11 : f32 to vector<512x128xf32>
      %c0_12 = arith.constant 0 : index
      %c0_13 = arith.constant 0 : index
      %14 = vector.load %arg6[%c0_12, %c0_13] : memref<512x128xf32, #tpu.memory_space<vmem>>, vector<512x128xf32>
      tpu.vector_store %arg6[%c0_12, %c0_13], %13 {strides = array<i32>} : memref<512x128xf32, #tpu.memory_space<vmem>>, vector<512x128xf32>,
    } else {
    }
    %c0 = arith.constant 0 : index
    %c0_1 = arith.constant 0 : index
    %3 = vector.load %arg6[%c0, %c0_1] : memref<512x128xf32, #tpu.memory_space<vmem>>, vector<512x128xf32>
    %c0_2 = arith.constant 0 : index
    %c0_3 = arith.constant 0 : index
    %c0_4 = arith.constant 0 : index
    %4 = vector.load %arg3[%c0_2, %c0_3, %c0_4] : memref<1x512x128xbf16, #tpu.memory_space<vmem>>, vector<1x512x128xbf16>
    %5 = vector.shape_cast %4 : vector<1x512x128xbf16> to vector<512x128xbf16>
    %c0_5 = arith.constant 0 : index
    %c0_6 = arith.constant 0 : index
    %6 = vector.load %arg4[%c0_5, %c0_6] : memref<128x128xbf16, #tpu.memory_space<vmem>>, vector<128x128xbf16>
    %cst = arith.constant dense<0.000000e+00> : vector<512x128xf32>
    %7 = tpu.matmul %5, %6, %cst {dimension_numbers = #tpu.dot_dimension_numbers<[1], [0], [0], [1], [0, 0, 1, 1], [], []>} : vector<512x128xbf16>, vector<128x128xbf16>, vector<512x128xf32> -> vector<512x128xf32>
    %8 = arith.addf %3, %7 : vector<512x128xf32>
    %c0_7 = arith.constant 0 : index
    %c0_8 = arith.constant 0 : index
    %9 = vector.load %arg6[%c0_7, %c0_8] : memref<512x128xf32, #tpu.memory_space<vmem>>, vector<512x128xf32>
    tpu.vector_store %arg6[%c0_7, %c0_8], %8 {strides = array<i32>} : memref<512x128xf32, #tpu.memory_space<vmem>>, vector<512x128xf32>,
    %c0_i32_9 = arith.constant 0 : i32
    %10 = arith.cmpi eq, %arg2, %c0_i32_9 : i32
    %11 = arith.extui %10 : i1 to i32
    %c0_i32_10 = arith.constant 0 : i32
    %12 = arith.cmpi ne, %11, %c0_i32_10 : i32
    scf.if %12 {
      %c0_11 = arith.constant 0 : index
      %c0_12 = arith.constant 0 : index
      %13 = vector.load %arg6[%c0_11, %c0_12] : memref<512x128xf32, #tpu.memory_space<vmem>>, vector<512x128xf32>
      %cst_13 = arith.constant dense<0.000000e+00> : vector<128xf32>
      %14 = vector.multi_reduction <add>, %13, %cst_13 [0] : vector<512x128xf32> to vector<128xf32>
      %15 = vector.shape_cast %14 : vector<128xf32> to vector<1x128xf32>
      %c0_14 = arith.constant 0 : index
      %c0_15 = arith.constant 0 : index
      %c0_16 = arith.constant 0 : index
      %c0_17 = arith.constant 0 : index
      %16 = vector.load %arg5[%c0_14, %c0_15, %c0_16, %c0_17] : memref<1x1x2x128xf32, #tpu.memory_space<vmem>>, vector<1x1x1x128xf32>
      %17 = vector.shape_cast %16 : vector<1x1x1x128xf32> to vector<1x128xf32>
      %18 = vector.shape_cast %15 : vector<1x128xf32> to vector<1x1x1x128xf32>
      tpu.vector_store %arg5[%c0_14, %c0_15, %c0_16, %c0_17], %18 {strides = array<i32>} : memref<1x1x2x128xf32, #tpu.memory_space<vmem>>, vector<1x1x1x128xf32>,
      %19 = arith.mulf %13, %13 : vector<512x128xf32>
      %cst_18 = arith.constant dense<0.000000e+00> : vector<128xf32>
      %20 = vector.multi_reduction <add>, %19, %cst_18 [0] : vector<512x128xf32> to vector<128xf32>
      %21 = vector.shape_cast %20 : vector<128xf32> to vector<1x128xf32>
      %c0_19 = arith.constant 0 : index
      %c0_20 = arith.constant 0 : index
      %c1 = arith.constant 1 : index
      %c0_21 = arith.constant 0 : index
      %22 = vector.load %arg5[%c0_19, %c0_20, %c1, %c0_21] : memref<1x1x2x128xf32, #tpu.memory_space<vmem>>, vector<1x1x1x128xf32>
      %23 = vector.shape_cast %22 : vector<1x1x1x128xf32> to vector<1x128xf32>
      %24 = vector.shape_cast %21 : vector<1x128xf32> to vector<1x1x1x128xf32>
      tpu.vector_store %arg5[%c0_19, %c0_20, %c1, %c0_21], %24 {strides = array<i32>} : memref<1x1x2x128xf32, #tpu.memory_space<vmem>>, vector<1x1x1x128xf32>,
    } else {
    }
    return
  }
  func.func @transform_0(%arg0: i32, %arg1: i32, %arg2: i32) -> (i32, i32, i32) {
    %c0_i32 = arith.constant 0 : i32
    return %arg0, %arg1, %arg2 : i32, i32, i32
  }
  func.func @transform_1(%arg0: i32, %arg1: i32, %arg2: i32) -> (i32, i32) {
    %c0_i32 = arith.constant 0 : i32
    %c0_i32_0 = arith.constant 0 : i32
    return %arg2, %c0_i32 : i32, i32
  }
  func.func @transform_2(%arg0: i32, %arg1: i32, %arg2: i32) -> (i32, i32, i32, i32) {
    %c0_i32 = arith.constant 0 : i32
    %c0_i32_0 = arith.constant 0 : i32
    %c0_i32_1 = arith.constant 0 : i32
    return %arg0, %arg1, %c0_i32, %c0_i32_0 : i32, i32, i32, i32
  }
}

module attributes {stable_mosaic.version = 11 : i64} {
  func.func @_gemm_norm_kernel(%arg0: i32, %arg1: i32, %arg2: i32, %arg3: memref<1x512x128xbf16, #tpu.memory_space<vmem>>, %arg4: memref<128x128xbf16, #tpu.memory_space<vmem>>, %arg5: memref<1x128xf32, #tpu.memory_space<vmem>>, %arg6: memref<1x128xf32, #tpu.memory_space<vmem>>, %arg7: memref<1x128x512xf32, #tpu.memory_space<vmem>>, %arg8: memref<512x128xf32, #tpu.memory_space<vmem>>) attributes {dimension_semantics = [#tpu.dimension_semantics<parallel>, #tpu.dimension_semantics<parallel>, #tpu.dimension_semantics<arbitrary>], iteration_bounds = array<i64: 2, 1, 1>, scalar_prefetch = 0 : i64, scratch_operands = 1 : i64, tpu.core_type = #tpu.core_type<tc>, window_params = [{transform_indices = @transform_0, window_bounds = array<i64: 1, 512, 128>}, {transform_indices = @transform_1, window_bounds = array<i64: 128, 128>}, {pipeline_mode = #tpu.pipeline_mode<synchronous>, transform_indices = @transform_2, window_bounds = array<i64: 1, 128>}, {pipeline_mode = #tpu.pipeline_mode<synchronous>, transform_indices = @transform_3, window_bounds = array<i64: 1, 128>}, {transform_indices = @transform_4, window_bounds = array<i64: 1, 128, 512>}]} {
    %c0_i32 = arith.constant 0 : i32
    %0 = arith.cmpi eq, %arg2, %c0_i32 : i32
    %1 = arith.extui %0 : i1 to i32
    %c0_i32_0 = arith.constant 0 : i32
    %2 = arith.cmpi ne, %1, %c0_i32_0 : i32
    scf.if %2 {
      %cst_11 = arith.constant 0.000000e+00 : f32
      %13 = vector.broadcast %cst_11 : f32 to vector<512x128xf32>
      %c0_12 = arith.constant 0 : index
      %c0_13 = arith.constant 0 : index
      %14 = vector.load %arg8[%c0_12, %c0_13] : memref<512x128xf32, #tpu.memory_space<vmem>>, vector<512x128xf32>
      tpu.vector_store %arg8[%c0_12, %c0_13], %13 {strides = array<i32>} : memref<512x128xf32, #tpu.memory_space<vmem>>, vector<512x128xf32>,
    } else {
    }
    %c0 = arith.constant 0 : index
    %c0_1 = arith.constant 0 : index
    %3 = vector.load %arg8[%c0, %c0_1] : memref<512x128xf32, #tpu.memory_space<vmem>>, vector<512x128xf32>
    %c0_2 = arith.constant 0 : index
    %c0_3 = arith.constant 0 : index
    %c0_4 = arith.constant 0 : index
    %4 = vector.load %arg3[%c0_2, %c0_3, %c0_4] : memref<1x512x128xbf16, #tpu.memory_space<vmem>>, vector<1x512x128xbf16>
    %5 = vector.shape_cast %4 : vector<1x512x128xbf16> to vector<512x128xbf16>
    %c0_5 = arith.constant 0 : index
    %c0_6 = arith.constant 0 : index
    %6 = vector.load %arg4[%c0_5, %c0_6] : memref<128x128xbf16, #tpu.memory_space<vmem>>, vector<128x128xbf16>
    %cst = arith.constant dense<0.000000e+00> : vector<512x128xf32>
    %7 = tpu.matmul %5, %6, %cst {dimension_numbers = #tpu.dot_dimension_numbers<[1], [0], [0], [1], [0, 0, 1, 1], [], []>} : vector<512x128xbf16>, vector<128x128xbf16>, vector<512x128xf32> -> vector<512x128xf32>
    %8 = arith.addf %3, %7 : vector<512x128xf32>
    %c0_7 = arith.constant 0 : index
    %c0_8 = arith.constant 0 : index
    %9 = vector.load %arg8[%c0_7, %c0_8] : memref<512x128xf32, #tpu.memory_space<vmem>>, vector<512x128xf32>
    tpu.vector_store %arg8[%c0_7, %c0_8], %8 {strides = array<i32>} : memref<512x128xf32, #tpu.memory_space<vmem>>, vector<512x128xf32>,
    %c0_i32_9 = arith.constant 0 : i32
    %10 = arith.cmpi eq, %arg2, %c0_i32_9 : i32
    %11 = arith.extui %10 : i1 to i32
    %c0_i32_10 = arith.constant 0 : i32
    %12 = arith.cmpi ne, %11, %c0_i32_10 : i32
    scf.if %12 {
      %c0_11 = arith.constant 0 : index
      %c0_12 = arith.constant 0 : index
      %13 = vector.load %arg8[%c0_11, %c0_12] : memref<512x128xf32, #tpu.memory_space<vmem>>, vector<512x128xf32>
      %c0_13 = arith.constant 0 : index
      %c0_14 = arith.constant 0 : index
      %14 = vector.load %arg5[%c0_13, %c0_14] : memref<1x128xf32, #tpu.memory_space<vmem>>, vector<1x128xf32>
      %15 = vector.broadcast %14 : vector<1x128xf32> to vector<512x128xf32>
      %16 = arith.mulf %13, %15 : vector<512x128xf32>
      %c0_15 = arith.constant 0 : index
      %c0_16 = arith.constant 0 : index
      %17 = vector.load %arg6[%c0_15, %c0_16] : memref<1x128xf32, #tpu.memory_space<vmem>>, vector<1x128xf32>
      %18 = vector.broadcast %17 : vector<1x128xf32> to vector<512x128xf32>
      %19 = arith.addf %16, %18 : vector<512x128xf32>
      %20 = tpu.transpose %19, [1, 0] : vector<512x128xf32> -> vector<128x512xf32>
      %c0_17 = arith.constant 0 : index
      %c0_18 = arith.constant 0 : index
      %c0_19 = arith.constant 0 : index
      %21 = vector.load %arg7[%c0_17, %c0_18, %c0_19] : memref<1x128x512xf32, #tpu.memory_space<vmem>>, vector<1x128x512xf32>
      %22 = vector.shape_cast %21 : vector<1x128x512xf32> to vector<128x512xf32>
      %23 = vector.shape_cast %20 : vector<128x512xf32> to vector<1x128x512xf32>
      tpu.vector_store %arg7[%c0_17, %c0_18, %c0_19], %23 {strides = array<i32>} : memref<1x128x512xf32, #tpu.memory_space<vmem>>, vector<1x128x512xf32>,
    } else {
    }
    return
  }
  func.func @transform_0(%arg0: i32, %arg1: i32, %arg2: i32) -> (i32, i32, i32) {
    %c0_i32 = arith.constant 0 : i32
    return %arg0, %arg1, %arg2 : i32, i32, i32
  }
  func.func @transform_1(%arg0: i32, %arg1: i32, %arg2: i32) -> (i32, i32) {
    %c0_i32 = arith.constant 0 : i32
    %c0_i32_0 = arith.constant 0 : i32
    return %arg2, %c0_i32 : i32, i32
  }
  func.func @transform_2(%arg0: i32, %arg1: i32, %arg2: i32) -> (i32, i32) {
    %c0_i32 = arith.constant 0 : i32
    %c0_i32_0 = arith.constant 0 : i32
    %c0_i32_1 = arith.constant 0 : i32
    return %c0_i32, %c0_i32_0 : i32, i32
  }
  func.func @transform_3(%arg0: i32, %arg1: i32, %arg2: i32) -> (i32, i32) {
    %c0_i32 = arith.constant 0 : i32
    %c0_i32_0 = arith.constant 0 : i32
    %c0_i32_1 = arith.constant 0 : i32
    return %c0_i32, %c0_i32_0 : i32, i32
  }
  func.func @transform_4(%arg0: i32, %arg1: i32, %arg2: i32) -> (i32, i32, i32) {
    %c0_i32 = arith.constant 0 : i32
    %c0_i32_0 = arith.constant 0 : i32
    return %arg0, %c0_i32, %arg1 : i32, i32, i32
  }
}

</mosaic_0001>

<bundles_post_ra>
// kernel: unet_down_block.2
= control target key start
LH: loop header
LB: loop body
LE: loop exit
PB: predicated region body
PF: predicated region fallthrough
CT: control target
= control target key end

     0   :  { %s1749_s9 = smov 0   ;;  %s1751_s10 = smov 0   ;;  %s2004_s0 = inlined_call_operand.vmem [shape: bf16[2,512,128], index: 0, kind: input, shape index: {}]   ;;  %s2005_s1 = inlined_call_operand.vmem [shape: bf16[128,128], index: 1, kind: input, shape index: {}]   ;;  %s2006_s2 = inlined_call_operand.vmem [shape: f32[2,1,2,128], index: 2, kind: output, shape index: {}]  }
   0x1   :  { %s1753_s11 = smov 0  }
   0x2 LB: > { %s31_s12 = sadd.s32 1, %s1728_s10  ;;  %p1463_p0 = scmp.ge.s32.totalorder %s1732_s11, 1  ;;  %s1732_s11 = sphi %s1753_s11, %s12_s11   ;;  %s1728_s10 = sphi %s1751_s10, %s2008_s10   ;;  %s1724_s9 = sphi %s1749_s9, %s2007_s9  }
   0x3   : > { %p33_p1 = scmp.ge.s32.totalorder %s31_s12, 2  ;;  %p156_p2 = scmp.lt.s32.totalorder %s1732_s11, 3 }
   0x5   : > { %s2010_s12 = smov (%p33_p1, %s31_s12), 0  ;;  %p157_p3 = pnand %p1463_p0, %p156_p2 }
   0x6   : > { %v1670_v0 = vld [vmem:[%s2005_s1] sm:$0xff] (!%p157_p3)   ;;  %p193_p4 = scmp.lt.s32.totalorder (!%p157_p3), %s1724_s9, 1  ;;  %v1671_v1 = vld [vmem:[%s2005_s1 + $0x8] sm:$0xff] (!%p157_p3)   ;;  %v1672_v2 = vld [vmem:[%s2005_s1 + $0x10] sm:$0xff] (!%p157_p3)  }
   0x7   : > { %160 = sbr.rel (%p157_p3) target bundleno = 395 (0x18b), region = 28  ;;  %1550 = vmatprep.subr.bf16.mxu0 (!%p157_p3), %v1670_v0  ;;  %1630 = vmatprep.subr.bf16.mxu1 (!%p157_p3), %v1670_v0  ;;  %v1673_v3 = vld [vmem:[%s2005_s1 + $0x18] sm:$0xff] (!%p157_p3)   ;;  %v1674_v5 = vld [vmem:[%s2005_s1 + $0x20] sm:$0xff] (!%p157_p3)   ;;  %v1675_v6 = vld [vmem:[%s2005_s1 + $0x28] sm:$0xff] (!%p157_p3)  }
   0x8   : > { %1551 = vmatpush3.bf16.msra.mxu0 (!%p157_p3), %v1670_v0  ;;  %1638 = vmatpush3.bf16.msra.mxu1 (!%p157_p3), %v1670_v0  ;;  %v1676_v7 = vld [vmem:[%s2005_s1 + $0x30] sm:$0xff] (!%p157_p3)   ;;  %v1677_v8 = vld [vmem:[%s2005_s1 + $0x38] sm:$0xff] (!%p157_p3)  }
   0x9   : > { %1552 = vmatprep.subr.bf16.mxu0 (!%p157_p3), %v1671_v1  ;;  %1631 = vmatprep.subr.bf16.mxu1 (!%p157_p3), %v1671_v1 }
   0xc   : > { %1553 = vmatpush3.bf16.msra.mxu0 (!%p157_p3), %v1671_v1  ;;  %1639 = vmatpush3.bf16.msra.mxu1 (!%p157_p3), %v1671_v1 }
   0xd   : > { %1554 = vmatprep.subr.bf16.mxu0 (!%p157_p3), %v1672_v2  ;;  %1632 = vmatprep.subr.bf16.mxu1 (!%p157_p3), %v1672_v2 }
   0xe   : > { %s2012_s9 = smov (!%p193_p4, %s1724_s9), 1 }
   0xf   : > { %s1509_s19 = sshll.u32 %s2012_s9, 8  ;;  %s1466_s5 = sshll.u32 %s2012_s9, 1 }
  0x10   : > { %s1782_s22 = scalar_lea.vmem %s2004_s0, %s1509_s19  ;;  %1555 = vmatpush3.bf16.msra.mxu0 %v1672_v2  ;;  %1640 = vmatpush3.bf16.msra.mxu1 %v1672_v2  ;;  %s217_s8 = scalar_lea.vmem %s2006_s2, %s1466_s5 }
  0x11   : > { %v1678_v4 = vld [vmem:[%s1782_s22] sm:$0xff]   ;;  %1556 = vmatprep.subr.bf16.mxu0 %v1673_v3  ;;  %1633 = vmatprep.subr.bf16.mxu1 %v1673_v3  ;;  %v1679_v10 = vld [vmem:[%s1782_s22 + $0x8] sm:$0xff]   ;;  %v1680_v11 = vld [vmem:[%s1782_s22 + $0x10] sm:$0xff]  }
  0x12   : > { %1566 = vmatprep.mubr.bf16.mxu0 %v1678_v4  ;;  %v1694_v9 = vld [vmem:[%s1782_s22 + $0x80] sm:$0xff]   ;;  %v1695_v12 = vld [vmem:[%s1782_s22 + $0x88] sm:$0xff]   ;;  %v1696_v13 = vld [vmem:[%s1782_s22 + $0x90] sm:$0xff]  }
  0x13   : > { %1598 = vmatprep.mubr.bf16.mxu1 %v1694_v9  ;;  %v1681_v14 = vld [vmem:[%s1782_s22 + $0x18] sm:$0xff]   ;;  %v1682_v15 = vld [vmem:[%s1782_s22 + $0x20] sm:$0xff]   ;;  %v1683_v18 = vld [vmem:[%s1782_s22 + $0x28] sm:$0xff]  }
  0x14   : > { %1557 = vmatpush3.bf16.msra.mxu0 %v1673_v3  ;;  %1641 = vmatpush3.bf16.msra.mxu1 %v1673_v3  ;;  %v1697_v16 = vld [vmem:[%s1782_s22 + $0x98] sm:$0xff]   ;;  %v1698_v17 = vld [vmem:[%s1782_s22 + $0xa0] sm:$0xff]   ;;  %v1699_v19 = vld [vmem:[%s1782_s22 + $0xa8] sm:$0xff]  }
  0x15   : > { %1558 = vmatprep.subr.bf16.mxu0 %v1674_v5  ;;  %1634 = vmatprep.subr.bf16.mxu1 %v1674_v5  ;;  %v1684_v20 = vld [vmem:[%s1782_s22 + $0x30] sm:$0xff]   ;;  %v1685_v22 = vld [vmem:[%s1782_s22 + $0x38] sm:$0xff]   ;;  %v1686_v24 = vld [vmem:[%s1782_s22 + $0x40] sm:$0xff]  }
  0x16   : > { %v1700_v21 = vld [vmem:[%s1782_s22 + $0xb0] sm:$0xff]   ;;  %v1701_v23 = vld [vmem:[%s1782_s22 + $0xb8] sm:$0xff]   ;;  %v1702_v25 = vld [vmem:[%s1782_s22 + $0xc0] sm:$0xff]  }
  0x17   : > { %v1687_v26 = vld [vmem:[%s1782_s22 + $0x48] sm:$0xff]   ;;  %v1688_v28 = vld [vmem:[%s1782_s22 + $0x50] sm:$0xff]   ;;  %v1689_v30 = vld [vmem:[%s1782_s22 + $0x58] sm:$0xff]  }
  0x18   : > { %1559 = vmatpush3.bf16.msra.mxu0 %v1674_v5  ;;  %1642 = vmatpush3.bf16.msra.mxu1 %v1674_v5  ;;  %v1703_v27 = vld [vmem:[%s1782_s22 + $0xc8] sm:$0xff]   ;;  %v1704_v29 = vld [vmem:[%s1782_s22 + $0xd0] sm:$0xff]   ;;  %v1705_v31 = vld [vmem:[%s1782_s22 + $0xd8] sm:$0xff]  }
  0x19   : > { %1560 = vmatprep.subr.bf16.mxu0 %v1675_v6  ;;  %1635 = vmatprep.subr.bf16.mxu1 %v1675_v6  ;;  %v1690_v32 = vld [vmem:[%s1782_s22 + $0x60] sm:$0xff]   ;;  %v1691_v34 = vld [vmem:[%s1782_s22 + $0x68] sm:$0xff]   ;;  %v1692_v36 = vld [vmem:[%s1782_s22 + $0x70] sm:$0xff]  }
  0x1a   : > { %v1706_v33 = vld [vmem:[%s1782_s22 + $0xe0] sm:$0xff]   ;;  %v1707_v35 = vld [vmem:[%s1782_s22 + $0xe8] sm:$0xff]   ;;  %v1708_v37 = vld [vmem:[%s1782_s22 + $0xf0] sm:$0xff]  }
  0x1b   : > { %v1693_v38 = vld [vmem:[%s1782_s22 + $0x78] sm:$0xff]  }
  0x1c   : > { %1561 = vmatpush3.bf16.msra.mxu0 %v1675_v6  ;;  %1643 = vmatpush3.bf16.msra.mxu1 %v1675_v6  ;;  %v1709_v39 = vld [vmem:[%s1782_s22 + $0xf8] sm:$0xff]  }
  0x1d   : > { %1562 = vmatprep.subr.bf16.mxu0 %v1676_v7  ;;  %1636 = vmatprep.subr.bf16.mxu1 %v1676_v7 }
  0x20   : > { %1563 = vmatpush3.bf16.msra.mxu0 %v1676_v7  ;;  %1644 = vmatpush3.bf16.msra.mxu1 %v1676_v7 }
  0x21   : > { %1564 = vmatprep.subr.bf16.mxu0 %v1677_v8  ;;  %1637 = vmatprep.subr.bf16.mxu1 %v1677_v8 }
  0x24   : > { %1565 = vmatpush3.bf16.msra.mxu0 %v1677_v8  ;;  %1645 = vmatpush3.bf16.msra.mxu1 %v1677_v8 }
  0x27   : > { %1567 = vmatmul.mubr.bf16.vlgmr.msra.gmra.mrb[0].mxu0 %v1679_v10  ;;  %1599 = vmatmul.mubr.bf16.vlgmr.msra.gmra.mrb[0].mxu1 %v1695_v12 }
  0x28   : > { %1570 = vmatprep.mubr.bf16.mxu0 %v1680_v11  ;;  %1602 = vmatprep.mubr.bf16.mxu1 %v1696_v13 }
  0x2f   : > { %1571 = vmatmul.mubr.bf16.gmra.mrb[4].mxu0 %v1681_v14  ;;  %1603 = vmatmul.mubr.bf16.gmra.mrb[4].mxu1 %v1697_v16 }
  0x30   : > { %1574 = vmatprep.mubr.bf16.mxu0 %v1682_v15  ;;  %1606 = vmatprep.mubr.bf16.mxu1 %v1698_v17 }
  0x37   : > { %1575 = vmatmul.mubr.bf16.gmra.mrb[8].mxu0 %v1683_v18  ;;  %1607 = vmatmul.mubr.bf16.gmra.mrb[8].mxu1 %v1699_v19 }
  0x38   : > { %1578 = vmatprep.mubr.bf16.mxu0 %v1684_v20  ;;  %1610 = vmatprep.mubr.bf16.mxu1 %v1700_v21 }
  0x3f   : > { %1579 = vmatmul.mubr.bf16.gmra.mrb[12].mxu0 %v1685_v22  ;;  %1611 = vmatmul.mubr.bf16.gmra.mrb[12].mxu1 %v1701_v23 }
  0x40   : > { %1582 = vmatprep.mubr.bf16.mxu0 %v1686_v24  ;;  %1614 = vmatprep.mubr.bf16.mxu1 %v1702_v25 }
  0x47   : > { %1583 = vmatmul.mubr.bf16.gmra.mrb[16].mxu0 %v1687_v26  ;;  %1615 = vmatmul.mubr.bf16.gmra.mrb[16].mxu1 %v1703_v27 }
  0x48   : > { %1586 = vmatprep.mubr.bf16.mxu0 %v1688_v28  ;;  %1618 = vmatprep.mubr.bf16.mxu1 %v1704_v29 }
  0x4f   : > { %1587 = vmatmul.mubr.bf16.gmra.mrb[20].mxu0 %v1689_v30  ;;  %1619 = vmatmul.mubr.bf16.gmra.mrb[20].mxu1 %v1705_v31 }
  0x50   : > { %1590 = vmatprep.mubr.bf16.mxu0 %v1690_v32  ;;  %1622 = vmatprep.mubr.bf16.mxu1 %v1706_v33 }
  0x57   : > { %1591 = vmatmul.mubr.bf16.gmra.mrb[24].mxu0 %v1691_v34  ;;  %1623 = vmatmul.mubr.bf16.gmra.mrb[24].mxu1 %v1707_v35 }
  0x58   : > { %1594 = vmatprep.mubr.bf16.mxu0 %v1692_v36  ;;  %1626 = vmatprep.mubr.bf16.mxu1 %v1708_v37 }
  0x5f   : > { %1595 = vmatmul.mubr.bf16.gmra.mrb[28].mxu0 %v1693_v38  ;;  %1627 = vmatmul.mubr.bf16.gmra.mrb[28].mxu1 %v1709_v39 }
  0xfa   : > { %v1568_v40 = vpop.f32.mrb[0].mxu0  ;;  %v1831_v41 = vpop.f32.mrb[0].mxu1 }
  0xfb   : > { %v705_v42 = vpop.f32.mrb[1].mxu0  ;;  %v1833_v43 = vpop.f32.mrb[1].mxu1  ;;  %v1227_v51 = vmul.f32 %v1568_v40, %v1568_v40 }
  0xfc   : > { %v1569_v44 = vpop.f32.mrb[2].mxu0  ;;  %v1835_v45 = vpop.f32.mrb[2].mxu1  ;;  %v1225_v48 = vmul.f32 %v705_v42, %v705_v42 }
  0xfd   : > { %v708_v46 = vpop.f32.mrb[3].mxu0  ;;  %v1837_v47 = vpop.f32.mrb[3].mxu1  ;;  %v1228_v54 = vmul.f32 %v1569_v44, %v1569_v44 }
  0xfe   : > { %v1155_v49 = vadd.f32 %v708_v46, %v705_v42  ;;  %v1226_v50 = vmul.f32 %v708_v46, %v708_v46 }
 0x100   : > { %v1156_v52 = vadd.f32 %v1568_v40, %v1155_v49  ;;  %v1289_v53 = vadd.f32 %v1226_v50, %v1225_v48 }
 0x102   : > { %v1290_v55 = vadd.f32 %v1289_v53, %v1227_v51  ;;  %v1572_v56 = vpop.f32.mrb[4].mxu0  ;;  %v1157_v57 = vadd.f32 %v1569_v44, %v1156_v52  ;;  %v1839_v58 = vpop.f32.mrb[4].mxu1 }
 0x103   : > { %v721_v59 = vpop.f32.mrb[5].mxu0  ;;  %v1841_v60 = vpop.f32.mrb[5].mxu1  ;;  %v1231_v7 = vmul.f32 %v1572_v56, %v1572_v56 }
 0x104   : > { %v1158_v61 = vadd.f32 %v1157_v57, %v721_v59  ;;  %v1229_v62 = vmul.f32 %v721_v59, %v721_v59  ;;  %v1291_v63 = vadd.f32 %v1290_v55, %v1228_v54  ;;  %v1573_v0 = vpop.f32.mrb[6].mxu0  ;;  %v1843_v1 = vpop.f32.mrb[6].mxu1 }
 0x105   : > { %v724_v2 = vpop.f32.mrb[7].mxu0  ;;  %v1845_v3 = vpop.f32.mrb[7].mxu1  ;;  %v1232_v10 = vmul.f32 %v1573_v0, %v1573_v0 }
 0x106   : > { %v1292_v4 = vadd.f32 %v1291_v63, %v1229_v62  ;;  %v1159_v5 = vadd.f32 %v1158_v61, %v724_v2  ;;  %v1230_v6 = vmul.f32 %v724_v2, %v724_v2 }
 0x108   : > { %v1160_v8 = vadd.f32 %v1572_v56, %v1159_v5  ;;  %v1293_v9 = vadd.f32 %v1292_v4, %v1230_v6 }
 0x10a   : > { %v1294_v11 = vadd.f32 %v1293_v9, %v1231_v7  ;;  %v1576_v12 = vpop.f32.mrb[8].mxu0  ;;  %v1161_v13 = vadd.f32 %v1573_v0, %v1160_v8  ;;  %v1847_v14 = vpop.f32.mrb[8].mxu1 }
 0x10b   : > { %v737_v15 = vpop.f32.mrb[9].mxu0  ;;  %v1849_v16 = vpop.f32.mrb[9].mxu1  ;;  %v1235_v27 = vmul.f32 %v1576_v12, %v1576_v12 }
 0x10c   : > { %v1162_v17 = vadd.f32 %v1161_v13, %v737_v15  ;;  %v1233_v18 = vmul.f32 %v737_v15, %v737_v15  ;;  %v1295_v19 = vadd.f32 %v1294_v11, %v1232_v10  ;;  %v1577_v20 = vpop.f32.mrb[10].mxu0  ;;  %v1851_v21 = vpop.f32.mrb[10].mxu1 }
 0x10d   : > { %v740_v22 = vpop.f32.mrb[11].mxu0  ;;  %v1853_v23 = vpop.f32.mrb[11].mxu1  ;;  %v1236_v30 = vmul.f32 %v1577_v20, %v1577_v20 }
 0x10e   : > { %v1296_v24 = vadd.f32 %v1295_v19, %v1233_v18  ;;  %v1163_v25 = vadd.f32 %v1162_v17, %v740_v22  ;;  %v1234_v26 = vmul.f32 %v740_v22, %v740_v22 }
 0x110   : > { %v1164_v28 = vadd.f32 %v1576_v12, %v1163_v25  ;;  %v1297_v29 = vadd.f32 %v1296_v24, %v1234_v26 }
 0x112   : > { %v1298_v31 = vadd.f32 %v1297_v29, %v1235_v27  ;;  %v1580_v32 = vpop.f32.mrb[12].mxu0  ;;  %v1165_v33 = vadd.f32 %v1577_v20, %v1164_v28  ;;  %v1855_v34 = vpop.f32.mrb[12].mxu1 }
 0x113   : > { %v753_v35 = vpop.f32.mrb[13].mxu0  ;;  %v1857_v36 = vpop.f32.mrb[13].mxu1  ;;  %v1239_v51 = vmul.f32 %v1580_v32, %v1580_v32 }
 0x114   : > { %v1166_v37 = vadd.f32 %v1165_v33, %v753_v35  ;;  %v1237_v38 = vmul.f32 %v753_v35, %v753_v35  ;;  %v1299_v39 = vadd.f32 %v1298_v31, %v1236_v30  ;;  %v1581_v40 = vpop.f32.mrb[14].mxu0  ;;  %v1859_v42 = vpop.f32.mrb[14].mxu1 }
 0x115   : > { %v756_v44 = vpop.f32.mrb[15].mxu0  ;;  %v1861_v46 = vpop.f32.mrb[15].mxu1  ;;  %v1240_v54 = vmul.f32 %v1581_v40, %v1581_v40 }
 0x116   : > { %v1300_v48 = vadd.f32 %v1299_v39, %v1237_v38  ;;  %v1167_v49 = vadd.f32 %v1166_v37, %v756_v44  ;;  %v1238_v50 = vmul.f32 %v756_v44, %v756_v44 }
 0x118   : > { %v1168_v52 = vadd.f32 %v1580_v32, %v1167_v49  ;;  %v1301_v53 = vadd.f32 %v1300_v48, %v1238_v50 }
 0x11a   : > { %v1302_v55 = vadd.f32 %v1301_v53, %v1239_v51  ;;  %v1584_v56 = vpop.f32.mrb[16].mxu0  ;;  %v1169_v57 = vadd.f32 %v1581_v40, %v1168_v52  ;;  %v1863_v59 = vpop.f32.mrb[16].mxu1 }
 0x11b   : > { %v769_v61 = vpop.f32.mrb[17].mxu0  ;;  %v1865_v62 = vpop.f32.mrb[17].mxu1  ;;  %v1243_v11 = vmul.f32 %v1584_v56, %v1584_v56 }
 0x11c   : > { %v1170_v63 = vadd.f32 %v1169_v57, %v769_v61  ;;  %v1241_v0 = vmul.f32 %v769_v61, %v769_v61  ;;  %v1303_v2 = vadd.f32 %v1302_v55, %v1240_v54  ;;  %v1585_v4 = vpop.f32.mrb[18].mxu0  ;;  %v1867_v5 = vpop.f32.mrb[18].mxu1 }
 0x11d   : > { %v772_v6 = vpop.f32.mrb[19].mxu0  ;;  %v1869_v7 = vpop.f32.mrb[19].mxu1  ;;  %v1244_v15 = vmul.f32 %v1585_v4, %v1585_v4 }
 0x11e   : > { %v1304_v8 = vadd.f32 %v1303_v2, %v1241_v0  ;;  %v1171_v9 = vadd.f32 %v1170_v63, %v772_v6  ;;  %v1242_v10 = vmul.f32 %v772_v6, %v772_v6 }
 0x120   : > { %v1172_v12 = vadd.f32 %v1584_v56, %v1171_v9  ;;  %v1305_v13 = vadd.f32 %v1304_v8, %v1242_v10 }
 0x122   : > { %v1306_v17 = vadd.f32 %v1305_v13, %v1243_v11  ;;  %v1588_v18 = vpop.f32.mrb[20].mxu0  ;;  %v1173_v19 = vadd.f32 %v1585_v4, %v1172_v12  ;;  %v1871_v20 = vpop.f32.mrb[20].mxu1 }
 0x123   : > { %v785_v22 = vpop.f32.mrb[21].mxu0  ;;  %v1873_v24 = vpop.f32.mrb[21].mxu1  ;;  %v1247_v37 = vmul.f32 %v1588_v18, %v1588_v18 }
 0x124   : > { %v1174_v25 = vadd.f32 %v1173_v19, %v785_v22  ;;  %v1245_v26 = vmul.f32 %v785_v22, %v785_v22  ;;  %v1307_v27 = vadd.f32 %v1306_v17, %v1244_v15  ;;  %v1589_v28 = vpop.f32.mrb[22].mxu0  ;;  %v1875_v29 = vpop.f32.mrb[22].mxu1 }
 0x125   : > { %v788_v30 = vpop.f32.mrb[23].mxu0  ;;  %v1877_v31 = vpop.f32.mrb[23].mxu1  ;;  %v1248_v40 = vmul.f32 %v1589_v28, %v1589_v28 }
 0x126   : > { %v1308_v32 = vadd.f32 %v1307_v27, %v1245_v26  ;;  %v1175_v33 = vadd.f32 %v1174_v25, %v788_v30  ;;  %v1246_v35 = vmul.f32 %v788_v30, %v788_v30 }
 0x128   : > { %v1176_v38 = vadd.f32 %v1588_v18, %v1175_v33  ;;  %v1309_v39 = vadd.f32 %v1308_v32, %v1246_v35 }
 0x12a   : > { %v1310_v44 = vadd.f32 %v1309_v39, %v1247_v37  ;;  %v1592_v48 = vpop.f32.mrb[24].mxu0  ;;  %v1177_v49 = vadd.f32 %v1589_v28, %v1176_v38  ;;  %v1879_v50 = vpop.f32.mrb[24].mxu1 }
 0x12b   : > { %v801_v51 = vpop.f32.mrb[25].mxu0  ;;  %v1881_v52 = vpop.f32.mrb[25].mxu1  ;;  %v1251_v6 = vmul.f32 %v1592_v48, %v1592_v48 }
 0x12c   : > { %v1178_v53 = vadd.f32 %v1177_v49, %v801_v51  ;;  %v1249_v54 = vmul.f32 %v801_v51, %v801_v51  ;;  %v1311_v55 = vadd.f32 %v1310_v44, %v1248_v40  ;;  %v1593_v56 = vpop.f32.mrb[26].mxu0  ;;  %v1883_v57 = vpop.f32.mrb[26].mxu1  ;;  %v1257_v49 = vmul.f32 %v1833_v43, %v1833_v43 }
 0x12d   : > { %v804_v61 = vpop.f32.mrb[27].mxu0  ;;  %v1885_v63 = vpop.f32.mrb[27].mxu1  ;;  %v1252_v10 = vmul.f32 %v1593_v56, %v1593_v56 }
 0x12e   : > { %v1312_v0 = vadd.f32 %v1311_v55, %v1249_v54  ;;  %v1179_v2 = vadd.f32 %v1178_v53, %v804_v61  ;;  %v1250_v4 = vmul.f32 %v804_v61, %v804_v61  ;;  %v1259_v61 = vmul.f32 %v1831_v41, %v1831_v41 }
 0x130   : > { %v1180_v8 = vadd.f32 %v1592_v48, %v1179_v2  ;;  %v1313_v9 = vadd.f32 %v1312_v0, %v1250_v4  ;;  %v1260_v4 = vmul.f32 %v1835_v45, %v1835_v45 }
 0x132   : > { %v1314_v11 = vadd.f32 %v1313_v9, %v1251_v6  ;;  %v1596_v12 = vpop.f32.mrb[28].mxu0  ;;  %v1181_v13 = vadd.f32 %v1593_v56, %v1180_v8  ;;  %v1887_v15 = vpop.f32.mrb[28].mxu1  ;;  %v1258_v56 = vmul.f32 %v1837_v47, %v1837_v47 }
 0x133   : > { %v817_v17 = vpop.f32.mrb[29].mxu0  ;;  %v1889_v18 = vpop.f32.mrb[29].mxu1  ;;  %v1255_v37 = vmul.f32 %v1596_v12, %v1596_v12 }
 0x134   : > { %v1182_v19 = vadd.f32 %v1181_v13, %v817_v17  ;;  %v1253_v22 = vmul.f32 %v817_v17, %v817_v17  ;;  %v1315_v25 = vadd.f32 %v1314_v11, %v1252_v10  ;;  %v1597_v26 = vpop.f32.mrb[30].mxu0  ;;  %v1891_v27 = vpop.f32.mrb[30].mxu1 }
 0x135   : > { %v820_v28 = vpop.f32.mrb[31].mxu0  ;;  %v1893_v30 = vpop.f32.mrb[31].mxu1  ;;  %v1256_v40 = vmul.f32 %v1597_v26, %v1597_v26 }
 0x136   : > { %v1316_v32 = vadd.f32 %v1315_v25, %v1253_v22  ;;  %v1183_v33 = vadd.f32 %v1182_v19, %v820_v28  ;;  %v1254_v35 = vmul.f32 %v820_v28, %v820_v28 }
 0x138   : > { %v1184_v38 = vadd.f32 %v1596_v12, %v1183_v33  ;;  %v1317_v39 = vadd.f32 %v1316_v32, %v1254_v35  ;;  %v1262_v12 = vmul.f32 %v1845_v3, %v1845_v3  ;;  %v1266_v32 = vmul.f32 %v1853_v23, %v1853_v23 }
 0x13a   : > { %v1318_v44 = vadd.f32 %v1317_v39, %v1255_v37  ;;  %v1185_v48 = vadd.f32 %v1597_v26, %v1184_v38 }
 0x13c   : > { %v1186_v51 = vadd.f32 %v1185_v48, %v1833_v43  ;;  %v1319_v53 = vadd.f32 %v1318_v44, %v1256_v40  ;;  %v1261_v43 = vmul.f32 %v1841_v60, %v1841_v60  ;;  %v1270_v48 = vmul.f32 %v1861_v46, %v1861_v46 }
 0x13e   : > { %v1320_v54 = vadd.f32 %v1319_v53, %v1257_v49  ;;  %v1187_v55 = vadd.f32 %v1186_v51, %v1837_v47 }
 0x140   : > { %v1188_v0 = vadd.f32 %v1831_v41, %v1187_v55  ;;  %v1321_v2 = vadd.f32 %v1320_v54, %v1258_v56  ;;  %v1263_v41 = vmul.f32 %v1839_v58, %v1839_v58 }
 0x142   : > { %v1322_v6 = vadd.f32 %v1321_v2, %v1259_v61  ;;  %v1189_v8 = vadd.f32 %v1835_v45, %v1188_v0  ;;  %v1264_v45 = vmul.f32 %v1843_v1, %v1843_v1  ;;  %v1274_v0 = vmul.f32 %v1869_v7, %v1869_v7 }
 0x144   : > { %v1190_v9 = vadd.f32 %v1189_v8, %v1841_v60  ;;  %v1323_v10 = vadd.f32 %v1322_v6, %v1260_v4  ;;  %v1265_v60 = vmul.f32 %v1849_v16, %v1849_v16 }
 0x146   : > { %v1324_v11 = vadd.f32 %v1323_v10, %v1261_v43  ;;  %v1191_v47 = vadd.f32 %v1190_v9, %v1845_v3 }
 0x148   : > { %v1192_v13 = vadd.f32 %v1839_v58, %v1191_v47  ;;  %v1325_v17 = vadd.f32 %v1324_v11, %v1262_v12  ;;  %v1267_v58 = vmul.f32 %v1847_v14, %v1847_v14  ;;  %v1278_v11 = vmul.f32 %v1877_v31, %v1877_v31 }
 0x14a   : > { %v1326_v19 = vadd.f32 %v1325_v17, %v1263_v41  ;;  %v1193_v22 = vadd.f32 %v1843_v1, %v1192_v13  ;;  %v1268_v1 = vmul.f32 %v1851_v21, %v1851_v21 }
 0x14c   : > { %v1194_v25 = vadd.f32 %v1193_v22, %v1849_v16  ;;  %v1327_v26 = vadd.f32 %v1326_v19, %v1264_v45  ;;  %v1269_v16 = vmul.f32 %v1857_v36, %v1857_v36  ;;  %v1282_v22 = vmul.f32 %v1885_v63, %v1885_v63 }
 0x14e   : > { %v1328_v28 = vadd.f32 %v1327_v26, %v1265_v60  ;;  %v1195_v3 = vadd.f32 %v1194_v25, %v1853_v23 }
 0x150   : > { %v1196_v33 = vadd.f32 %v1847_v14, %v1195_v3  ;;  %v1329_v35 = vadd.f32 %v1328_v28, %v1266_v32  ;;  %v1271_v14 = vmul.f32 %v1855_v34, %v1855_v34 }
 0x152   : > { %v1330_v37 = vadd.f32 %v1329_v35, %v1267_v58  ;;  %v1197_v38 = vadd.f32 %v1851_v21, %v1196_v33  ;;  %v1272_v21 = vmul.f32 %v1859_v42, %v1859_v42  ;;  %v1287_v33 = vmul.f32 %v1887_v15, %v1887_v15 }
 0x154   : > { %v1198_v39 = vadd.f32 %v1197_v38, %v1857_v36  ;;  %v1331_v40 = vadd.f32 %v1330_v37, %v1268_v1  ;;  %v1273_v36 = vmul.f32 %v1865_v62, %v1865_v62 }
 0x156   : > { %v1332_v44 = vadd.f32 %v1331_v40, %v1269_v16  ;;  %v1199_v23 = vadd.f32 %v1198_v39, %v1861_v46 }
 0x158   : > { %v1200_v49 = vadd.f32 %v1855_v34, %v1199_v23  ;;  %v1333_v51 = vadd.f32 %v1332_v44, %v1270_v48  ;;  %v1275_v34 = vmul.f32 %v1863_v59, %v1863_v59 }
 0x15a   : > { %v1334_v53 = vadd.f32 %v1333_v51, %v1271_v14  ;;  %v1201_v54 = vadd.f32 %v1859_v42, %v1200_v49  ;;  %v1276_v42 = vmul.f32 %v1867_v5, %v1867_v5 }
 0x15c   : > { %v1202_v55 = vadd.f32 %v1201_v54, %v1865_v62  ;;  %v1335_v56 = vadd.f32 %v1334_v53, %v1272_v21  ;;  %v1277_v62 = vmul.f32 %v1873_v24, %v1873_v24 }
 0x15e   : > { %v1336_v61 = vadd.f32 %v1335_v56, %v1273_v36  ;;  %v1203_v46 = vadd.f32 %v1202_v55, %v1869_v7 }
 0x160   : > { %v1204_v2 = vadd.f32 %v1863_v59, %v1203_v46  ;;  %v1337_v4 = vadd.f32 %v1336_v61, %v1274_v0  ;;  %v1279_v59 = vmul.f32 %v1871_v20, %v1871_v20 }
 0x162   : > { %v1338_v6 = vadd.f32 %v1337_v4, %v1275_v34  ;;  %v1205_v8 = vadd.f32 %v1867_v5, %v1204_v2  ;;  %v1280_v5 = vmul.f32 %v1875_v29, %v1875_v29 }
 0x164   : > { %v1206_v43 = vadd.f32 %v1205_v8, %v1873_v24  ;;  %v1339_v9 = vadd.f32 %v1338_v6, %v1276_v42  ;;  %v1281_v24 = vmul.f32 %v1881_v52, %v1881_v52 }
 0x166   : > { %v1340_v10 = vadd.f32 %v1339_v9, %v1277_v62  ;;  %v1207_v7 = vadd.f32 %v1206_v43, %v1877_v31 }
 0x168   : > { %v1208_v47 = vadd.f32 %v1871_v20, %v1207_v7  ;;  %v1341_v12 = vadd.f32 %v1340_v10, %v1278_v11  ;;  %v1283_v20 = vmul.f32 %v1879_v50, %v1879_v50 }
 0x16a   : > { %v1342_v41 = vadd.f32 %v1341_v12, %v1279_v59  ;;  %v1209_v13 = vadd.f32 %v1875_v29, %v1208_v47  ;;  %v1284_v29 = vmul.f32 %v1883_v57, %v1883_v57 }
 0x16c   : > { %v1210_v17 = vadd.f32 %v1209_v13, %v1881_v52  ;;  %v1343_v45 = vadd.f32 %v1342_v41, %v1280_v5  ;;  %v1285_v52 = vmul.f32 %v1889_v18, %v1889_v18 }
 0x16e   : > { %v1344_v19 = vadd.f32 %v1343_v45, %v1281_v24  ;;  %v1211_v31 = vadd.f32 %v1210_v17, %v1885_v63 }
 0x170   : > { %v1212_v60 = vadd.f32 %v1879_v50, %v1211_v31  ;;  %v1345_v25 = vadd.f32 %v1344_v19, %v1282_v22  ;;  %v1286_v50 = vmul.f32 %v1893_v30, %v1893_v30 }
 0x172   : > { %v1346_v26 = vadd.f32 %v1345_v25, %v1283_v20  ;;  %v1213_v28 = vadd.f32 %v1883_v57, %v1212_v60  ;;  %v1288_v57 = vmul.f32 %v1891_v27, %v1891_v27 }
 0x174   : > { %v1214_v3 = vadd.f32 %v1213_v28, %v1889_v18  ;;  %v1347_v32 = vadd.f32 %v1346_v26, %v1284_v29 }
 0x176   : > { %v1348_v63 = vadd.f32 %v1347_v32, %v1285_v52  ;;  %v1215_v58 = vadd.f32 %v1214_v3, %v1893_v30 }
 0x178   : > { %v1216_v35 = vadd.f32 %v1887_v15, %v1215_v58  ;;  %v1349_v1 = vadd.f32 %v1348_v63, %v1286_v50 }
 0x17a   : > { %v1217_v37 = vadd.f32 %v1891_v27, %v1216_v35  ;;  %v1350_v18 = vadd.f32 %v1349_v1, %v1287_v33 }
 0x17c   : > { %v1218_v38 = vrot.slane %v1217_v37, 4  ;;  %v1351_v16 = vadd.f32 %v1350_v18, %v1288_v57 }
 0x17e   : > { %v1219_v39 = vadd.f32 %v1218_v38, %v1217_v37  ;;  %v1352_v40 = vrot.slane %v1351_v16, 4 }
 0x180   : > { %v1220_v44 = vrot.slane %v1219_v39, 2  ;;  %v1353_v23 = vadd.f32 %v1352_v40, %v1351_v16 }
 0x182   : > { %v1221_v30 = vadd.f32 %v1220_v44, %v1219_v39  ;;  %v1354_v48 = vrot.slane %v1353_v23, 2 }
 0x184   : > { %v1222_v14 = vrot.slane %v1221_v30, 1  ;;  %v1355_v49 = vadd.f32 %v1354_v48, %v1353_v23 }
 0x186   : > { %v1223_v15 = vadd.f32 %v1222_v14, %v1221_v30  ;;  %v1356_v51 = vrot.slane %v1355_v49, 1 }
 0x188   : > { %1224 = vst [vmem:[%s217_s8] sm:$0x1] %v1223_v15  ;;  %v1357_v27 = vadd.f32 %v1356_v51, %v1355_v49 }
 0x18a   : > { %1358 = vst [vmem:[%s217_s8 + $0x1] sm:$0x1] %v1357_v27 }
 0x18b PF: > { %s12_s11 = sadd.s32 1, %s1732_s11   ;;  %s2007_s9 = smov %s1728_s10 }
 0x18c   : > { %p9_p5 = scmp.ge.s32.totalorder %s12_s11, 4   ;;  %s2008_s10 = smov %s2010_s12 }
 0x18e   :  { %11 = sbr.rel (!%p9_p5) target bundleno = 2 (0x2), region = 69 }

// kernel: unet_down_block.3
= control target key start
LH: loop header
LB: loop body
LE: loop exit
PB: predicated region body
PF: predicated region fallthrough
CT: control target
= control target key end

     0   :  { %s1961_s15 = smov 0   ;;  %s1963_s16 = smov 0   ;;  %s2368_s0 = inlined_call_operand.vmem [shape: bf16[2,512,128], index: 0, kind: input, shape index: {}]   ;;  %s2369_s1 = inlined_call_operand.vmem [shape: bf16[128,128], index: 1, kind: input, shape index: {}]   ;;  %s2370_s2 = inlined_call_operand.vmem [shape: f32[1,128], index: 2, kind: input, shape index: {}]   ;;  %s2371_s3 = inlined_call_operand.vmem [shape: f32[1,128], index: 3, kind: input, shape index: {}]   ;;  %s2372_s4 = inlined_call_operand.vmem [shape: f32[2,128,512], index: 4, kind: output, shape index: {}]  }
   0x1   :  { %s1965_s17 = smov 0  }
   0x2 LB: > { %s33_s18 = sadd.s32 1, %s1930_s16  ;;  %p1661_p0 = scmp.ge.s32.totalorder %s1934_s17, 1  ;;  %s1934_s17 = sphi %s1965_s17, %s14_s17   ;;  %s1930_s16 = sphi %s1963_s16, %s2374_s16   ;;  %s1926_s15 = sphi %s1961_s15, %s2373_s15  }
   0x3   : > { %p35_p1 = scmp.ge.s32.totalorder %s33_s18, 2  ;;  %p206_p2 = scmp.lt.s32.totalorder %s1934_s17, 3 }
   0x5   : > { %s2376_s18 = smov (%p35_p1, %s33_s18), 0  ;;  %p207_p3 = pnand %p1661_p0, %p206_p2 }
   0x6   : > { %v1872_v0 = vld [vmem:[%s2369_s1] sm:$0xff] (!%p207_p3)   ;;  %p249_p4 = scmp.lt.s32.totalorder (!%p207_p3), %s1926_s15, 1  ;;  %v1873_v1 = vld [vmem:[%s2369_s1 + $0x8] sm:$0xff] (!%p207_p3)   ;;  %v1874_v2 = vld [vmem:[%s2369_s1 + $0x10] sm:$0xff] (!%p207_p3)  }
   0x7   : > { %210 = sbr.rel (%p207_p3) target bundleno = 542 (0x21e), region = 36  ;;  %1752 = vmatprep.subr.bf16.mxu0 (!%p207_p3), %v1872_v0  ;;  %1832 = vmatprep.subr.bf16.mxu1 (!%p207_p3), %v1872_v0  ;;  %v1875_v3 = vld [vmem:[%s2369_s1 + $0x18] sm:$0xff] (!%p207_p3)   ;;  %v1876_v5 = vld [vmem:[%s2369_s1 + $0x20] sm:$0xff] (!%p207_p3)   ;;  %v1877_v6 = vld [vmem:[%s2369_s1 + $0x28] sm:$0xff] (!%p207_p3)  }
   0x8   : > { %1753 = vmatpush3.bf16.msra.mxu0 (!%p207_p3), %v1872_v0  ;;  %1840 = vmatpush3.bf16.msra.mxu1 (!%p207_p3), %v1872_v0  ;;  %v1878_v7 = vld [vmem:[%s2369_s1 + $0x30] sm:$0xff] (!%p207_p3)   ;;  %v1879_v9 = vld [vmem:[%s2369_s1 + $0x38] sm:$0xff] (!%p207_p3)   ;;  %v2046_v40 = vld [vmem:[%s2370_s2] ss:$0 sm:$0xff] (!%p207_p3) }
   0x9   : > { %1754 = vmatprep.subr.bf16.mxu0 (!%p207_p3), %v1873_v1  ;;  %1833 = vmatprep.subr.bf16.mxu1 (!%p207_p3), %v1873_v1  ;;  %v2051_v44 = vld [vmem:[%s2371_s3] ss:$0 sm:$0xff] (!%p207_p3) }
   0xc   : > { %1755 = vmatpush3.bf16.msra.mxu0 (!%p207_p3), %v1873_v1  ;;  %1841 = vmatpush3.bf16.msra.mxu1 (!%p207_p3), %v1873_v1 }
   0xd   : > { %1756 = vmatprep.subr.bf16.mxu0 (!%p207_p3), %v1874_v2  ;;  %1834 = vmatprep.subr.bf16.mxu1 (!%p207_p3), %v1874_v2 }
   0xe   : > { %s2378_s15 = smov (!%p249_p4, %s1926_s15), 1 }
   0xf   : > { %s1710_s25 = sshll.u32 %s2378_s15, 8  ;;  %s1711_s21 = sshll.u32 %s2378_s15, 9 }
  0x10   : > { %s1994_s28 = scalar_lea.vmem %s2368_s0, %s1710_s25  ;;  %1757 = vmatpush3.bf16.msra.mxu0 %v1874_v2  ;;  %1842 = vmatpush3.bf16.msra.mxu1 %v1874_v2  ;;  %s2287_s24 = scalar_lea.vmem %s2372_s4, %s1711_s21 }
  0x11   : > { %v1880_v4 = vld [vmem:[%s1994_s28] sm:$0xff]   ;;  %1758 = vmatprep.subr.bf16.mxu0 %v1875_v3  ;;  %1835 = vmatprep.subr.bf16.mxu1 %v1875_v3  ;;  %v1881_v10 = vld [vmem:[%s1994_s28 + $0x8] sm:$0xff]   ;;  %v1882_v11 = vld [vmem:[%s1994_s28 + $0x10] sm:$0xff]  }
  0x12   : > { %1768 = vmatprep.mubr.bf16.mxu0 %v1880_v4  ;;  %v1893_v8 = vld [vmem:[%s1994_s28 + $0x80] sm:$0xff]   ;;  %v1895_v12 = vld [vmem:[%s1994_s28 + $0x88] sm:$0xff]   ;;  %v1896_v13 = vld [vmem:[%s1994_s28 + $0x90] sm:$0xff]  }
  0x13   : > { %1800 = vmatprep.mubr.bf16.mxu1 %v1893_v8  ;;  %v1883_v14 = vld [vmem:[%s1994_s28 + $0x18] sm:$0xff]   ;;  %v1884_v15 = vld [vmem:[%s1994_s28 + $0x20] sm:$0xff]   ;;  %v1885_v18 = vld [vmem:[%s1994_s28 + $0x28] sm:$0xff]  }
  0x14   : > { %1759 = vmatpush3.bf16.msra.mxu0 %v1875_v3  ;;  %1843 = vmatpush3.bf16.msra.mxu1 %v1875_v3  ;;  %v1897_v16 = vld [vmem:[%s1994_s28 + $0x98] sm:$0xff]   ;;  %v1899_v17 = vld [vmem:[%s1994_s28 + $0xa0] sm:$0xff]   ;;  %v1901_v19 = vld [vmem:[%s1994_s28 + $0xa8] sm:$0xff]  }
  0x15   : > { %1760 = vmatprep.subr.bf16.mxu0 %v1876_v5  ;;  %1836 = vmatprep.subr.bf16.mxu1 %v1876_v5  ;;  %v1886_v20 = vld [vmem:[%s1994_s28 + $0x30] sm:$0xff]   ;;  %v1887_v22 = vld [vmem:[%s1994_s28 + $0x38] sm:$0xff]   ;;  %v1888_v24 = vld [vmem:[%s1994_s28 + $0x40] sm:$0xff]  }
  0x16   : > { %v1902_v21 = vld [vmem:[%s1994_s28 + $0xb0] sm:$0xff]   ;;  %v1903_v23 = vld [vmem:[%s1994_s28 + $0xb8] sm:$0xff]   ;;  %v1904_v25 = vld [vmem:[%s1994_s28 + $0xc0] sm:$0xff]  }
  0x17   : > { %v1889_v26 = vld [vmem:[%s1994_s28 + $0x48] sm:$0xff]   ;;  %v1890_v28 = vld [vmem:[%s1994_s28 + $0x50] sm:$0xff]   ;;  %v1891_v30 = vld [vmem:[%s1994_s28 + $0x58] sm:$0xff]  }
  0x18   : > { %1761 = vmatpush3.bf16.msra.mxu0 %v1876_v5  ;;  %1844 = vmatpush3.bf16.msra.mxu1 %v1876_v5  ;;  %v1905_v27 = vld [vmem:[%s1994_s28 + $0xc8] sm:$0xff]   ;;  %v1906_v29 = vld [vmem:[%s1994_s28 + $0xd0] sm:$0xff]   ;;  %v1907_v31 = vld [vmem:[%s1994_s28 + $0xd8] sm:$0xff]  }
  0x19   : > { %1762 = vmatprep.subr.bf16.mxu0 %v1877_v6  ;;  %1837 = vmatprep.subr.bf16.mxu1 %v1877_v6  ;;  %v1892_v32 = vld [vmem:[%s1994_s28 + $0x60] sm:$0xff]   ;;  %v1894_v34 = vld [vmem:[%s1994_s28 + $0x68] sm:$0xff]   ;;  %v1898_v36 = vld [vmem:[%s1994_s28 + $0x70] sm:$0xff]  }
  0x1a   : > { %v1908_v33 = vld [vmem:[%s1994_s28 + $0xe0] sm:$0xff]   ;;  %v1909_v35 = vld [vmem:[%s1994_s28 + $0xe8] sm:$0xff]   ;;  %v1910_v37 = vld [vmem:[%s1994_s28 + $0xf0] sm:$0xff]  }
  0x1b   : > { %v1900_v38 = vld [vmem:[%s1994_s28 + $0x78] sm:$0xff]  }
  0x1c   : > { %1763 = vmatpush3.bf16.msra.mxu0 %v1877_v6  ;;  %1845 = vmatpush3.bf16.msra.mxu1 %v1877_v6  ;;  %v1911_v39 = vld [vmem:[%s1994_s28 + $0xf8] sm:$0xff]  }
  0x1d   : > { %1764 = vmatprep.subr.bf16.mxu0 %v1878_v7  ;;  %1838 = vmatprep.subr.bf16.mxu1 %v1878_v7 }
  0x20   : > { %1765 = vmatpush3.bf16.msra.mxu0 %v1878_v7  ;;  %1846 = vmatpush3.bf16.msra.mxu1 %v1878_v7 }
  0x21   : > { %1766 = vmatprep.subr.bf16.mxu0 %v1879_v9  ;;  %1839 = vmatprep.subr.bf16.mxu1 %v1879_v9 }
  0x24   : > { %1767 = vmatpush3.bf16.msra.mxu0 %v1879_v9  ;;  %1847 = vmatpush3.bf16.msra.mxu1 %v1879_v9 }
  0x27   : > { %1769 = vmatmul.mubr.bf16.vlgmr.msra.gmra.mrb[0].mxu0 %v1881_v10  ;;  %1801 = vmatmul.mubr.bf16.vlgmr.msra.gmra.mrb[0].mxu1 %v1895_v12 }
  0x28   : > { %1772 = vmatprep.mubr.bf16.mxu0 %v1882_v11  ;;  %1804 = vmatprep.mubr.bf16.mxu1 %v1896_v13 }
  0x2f   : > { %1773 = vmatmul.mubr.bf16.gmra.mrb[4].mxu0 %v1883_v14  ;;  %1805 = vmatmul.mubr.bf16.gmra.mrb[4].mxu1 %v1897_v16 }
  0x30   : > { %1776 = vmatprep.mubr.bf16.mxu0 %v1884_v15  ;;  %1808 = vmatprep.mubr.bf16.mxu1 %v1899_v17 }
  0x37   : > { %1777 = vmatmul.mubr.bf16.gmra.mrb[8].mxu0 %v1885_v18  ;;  %1809 = vmatmul.mubr.bf16.gmra.mrb[8].mxu1 %v1901_v19 }
  0x38   : > { %1780 = vmatprep.mubr.bf16.mxu0 %v1886_v20  ;;  %1812 = vmatprep.mubr.bf16.mxu1 %v1902_v21 }
  0x3f   : > { %1781 = vmatmul.mubr.bf16.gmra.mrb[12].mxu0 %v1887_v22  ;;  %1813 = vmatmul.mubr.bf16.gmra.mrb[12].mxu1 %v1903_v23 }
  0x40   : > { %1784 = vmatprep.mubr.bf16.mxu0 %v1888_v24  ;;  %1816 = vmatprep.mubr.bf16.mxu1 %v1904_v25 }
  0x47   : > { %1785 = vmatmul.mubr.bf16.gmra.mrb[16].mxu0 %v1889_v26  ;;  %1817 = vmatmul.mubr.bf16.gmra.mrb[16].mxu1 %v1905_v27 }
  0x48   : > { %1788 = vmatprep.mubr.bf16.mxu0 %v1890_v28  ;;  %1820 = vmatprep.mubr.bf16.mxu1 %v1906_v29 }
  0x4f   : > { %1789 = vmatmul.mubr.bf16.gmra.mrb[20].mxu0 %v1891_v30  ;;  %1821 = vmatmul.mubr.bf16.gmra.mrb[20].mxu1 %v1907_v31 }
  0x50   : > { %1792 = vmatprep.mubr.bf16.mxu0 %v1892_v32  ;;  %1824 = vmatprep.mubr.bf16.mxu1 %v1908_v33 }
  0x57   : > { %1793 = vmatmul.mubr.bf16.gmra.mrb[24].mxu0 %v1894_v34  ;;  %1825 = vmatmul.mubr.bf16.gmra.mrb[24].mxu1 %v1909_v35 }
  0x58   : > { %1796 = vmatprep.mubr.bf16.mxu0 %v1898_v36  ;;  %1828 = vmatprep.mubr.bf16.mxu1 %v1910_v37 }
  0x5f   : > { %1797 = vmatmul.mubr.bf16.gmra.mrb[28].mxu0 %v1900_v38  ;;  %1829 = vmatmul.mubr.bf16.gmra.mrb[28].mxu1 %v1911_v39 }
  0xfa   : > { %v1770_v41 = vpop.f32.mrb[0].mxu0  ;;  %v1802_v42 = vpop.f32.mrb[0].mxu1 }
  0xfb   : > { %v764_v43 = vpop.f32.mrb[1].mxu0  ;;  %v1255_v45 = vmul.f32 %v1802_v42, %v2046_v40  ;;  %v892_v46 = vpop.f32.mrb[1].mxu1  ;;  %v1223_v61 = vmul.f32 %v1770_v41, %v2046_v40 }
  0xfc   : > { %v1221_v47 = vmul.f32 %v2046_v40, %v764_v43  ;;  %v1771_v48 = vpop.f32.mrb[2].mxu0  ;;  %v1253_v49 = vmul.f32 %v2046_v40, %v892_v46  ;;  %v1803_v50 = vpop.f32.mrb[2].mxu1 }
  0xfd   : > { %v767_v51 = vpop.f32.mrb[3].mxu0  ;;  %v2057_v52 = vadd.f32 %v2051_v44, %v1255_v45  ;;  %v1256_v53 = vmul.f32 %v1803_v50, %v2046_v40  ;;  %v895_v54 = vpop.f32.mrb[3].mxu1  ;;  %v1224_v11 = vmul.f32 %v1771_v48, %v2046_v40  ;;  %v1294_v12 = vadd.f32 %v2051_v44, %v1223_v61 }
  0xfe   : > { %v1222_v55 = vmul.f32 %v2046_v40, %v767_v51  ;;  %v1292_v56 = vadd.f32 %v2051_v44, %v1221_v47  ;;  %v1254_v57 = vmul.f32 %v2046_v40, %v895_v54  ;;  %v2064_v58 = vadd.f32 %v2051_v44, %v1253_v49 }
  0xff   : > { %v2067_v59 = vadd.f32 %v2051_v44, %v1256_v53  ;;  %v1295_v19 = vadd.f32 %v2051_v44, %v1224_v11 }
 0x100   : > { %1356 = vxpose.xlu0.b32.start [1/16] %v1292_v56, 128  ;;  %v2070_v60 = vadd.f32 %v2051_v44, %v1254_v57  ;;  %v1293_v63 = vadd.f32 %v2051_v44, %v1222_v55 }
 0x102   : > { %v1774_v62 = vpop.f32.mrb[4].mxu0  ;;  %v1806_v0 = vpop.f32.mrb[4].mxu1 }
 0x103   : > { %v780_v1 = vpop.f32.mrb[5].mxu0  ;;  %v1259_v2 = vmul.f32 %v1806_v0, %v2046_v40  ;;  %v908_v3 = vpop.f32.mrb[5].mxu1  ;;  %v1227_v37 = vmul.f32 %v1774_v62, %v2046_v40 }
 0x104   : > { %1357 = vxpose.xlu0.b32.cont [2/16] %v1293_v63, 128  ;;  %v1775_v4 = vpop.f32.mrb[6].mxu0  ;;  %v1257_v5 = vmul.f32 %v2046_v40, %v908_v3  ;;  %v1807_v6 = vpop.f32.mrb[6].mxu1  ;;  %v1225_v17 = vmul.f32 %v2046_v40, %v780_v1 }
 0x105   : > { %v783_v7 = vpop.f32.mrb[7].mxu0  ;;  %v2077_v8 = vadd.f32 %v2051_v44, %v1259_v2  ;;  %v1260_v9 = vmul.f32 %v1807_v6, %v2046_v40  ;;  %v911_v10 = vpop.f32.mrb[7].mxu1  ;;  %v1228_v54 = vmul.f32 %v1775_v4, %v2046_v40  ;;  %v1298_v55 = vadd.f32 %v2051_v44, %v1227_v37 }
 0x106   : > { %v2083_v13 = vadd.f32 %v2051_v44, %v1257_v5  ;;  %v1258_v14 = vmul.f32 %v2046_v40, %v911_v10  ;;  %v1226_v31 = vmul.f32 %v2046_v40, %v783_v7  ;;  %v1296_v32 = vadd.f32 %v2051_v44, %v1225_v17 }
 0x107   : > { %v2087_v15 = vadd.f32 %v2051_v44, %v1260_v9  ;;  %v1299_v1 = vadd.f32 %v2051_v44, %v1228_v54 }
 0x108   : > { %1358 = vxpose.xlu0.b32.cont [3/16] %v1294_v12, 128  ;;  %v2090_v16 = vadd.f32 %v2051_v44, %v1258_v14  ;;  %v1297_v39 = vadd.f32 %v2051_v44, %v1226_v31 }
 0x10a   : > { %v2093_v18 = vpop.f32.mrb[8].mxu0  ;;  %v1810_v20 = vpop.f32.mrb[8].mxu1 }
 0x10b   : > { %v796_v21 = vpop.f32.mrb[9].mxu0  ;;  %v1263_v22 = vmul.f32 %v1810_v20, %v2046_v40  ;;  %v924_v23 = vpop.f32.mrb[9].mxu1 }
 0x10c   : > { %1359 = vxpose.xlu0.b32.cont [4/16] %v1295_v19, 128  ;;  %v2097_v24 = vpop.f32.mrb[10].mxu0  ;;  %v1261_v25 = vmul.f32 %v2046_v40, %v924_v23  ;;  %v1811_v26 = vpop.f32.mrb[10].mxu1  ;;  %v1229_v63 = vmul.f32 %v2046_v40, %v796_v21 }
 0x10d   : > { %v799_v27 = vpop.f32.mrb[11].mxu0  ;;  %v2101_v28 = vadd.f32 %v2051_v44, %v1263_v22  ;;  %v1264_v29 = vmul.f32 %v1811_v26, %v2046_v40  ;;  %v927_v30 = vpop.f32.mrb[11].mxu1 }
 0x10e   : > { %v2107_v33 = vadd.f32 %v2051_v44, %v1261_v25  ;;  %v1262_v34 = vmul.f32 %v2046_v40, %v927_v30  ;;  %v1230_v11 = vmul.f32 %v2046_v40, %v799_v27  ;;  %v1300_v14 = vadd.f32 %v2051_v44, %v1229_v63 }
 0x10f   : > { %v2111_v35 = vadd.f32 %v2051_v44, %v1264_v29  ;;  %v1231_v29 = vmul.f32 %v2093_v18, %v2046_v40  ;;  %v1232_v18 = vmul.f32 %v2097_v24, %v2046_v40 }
 0x110   : > { %1360 = vxpose.xlu0.b32.cont [5/16] %v1296_v32, 128  ;;  %v2114_v36 = vadd.f32 %v2051_v44, %v1262_v34  ;;  %v1301_v31 = vadd.f32 %v2051_v44, %v1230_v11 }
 0x112   : > { %v2117_v38 = vpop.f32.mrb[12].mxu0  ;;  %v1814_v41 = vpop.f32.mrb[12].mxu1 }
 0x113   : > { %v2120_v42 = vpop.f32.mrb[13].mxu0  ;;  %v1267_v43 = vmul.f32 %v1814_v41, %v2046_v40  ;;  %v940_v45 = vpop.f32.mrb[13].mxu1 }
 0x114   : > { %1361 = vxpose.xlu0.b32.cont [6/16] %v1297_v39, 128  ;;  %v2123_v46 = vpop.f32.mrb[14].mxu0  ;;  %v1265_v47 = vmul.f32 %v2046_v40, %v940_v45  ;;  %v1815_v48 = vpop.f32.mrb[14].mxu1  ;;  %v1233_v24 = vmul.f32 %v2046_v40, %v2120_v42 }
 0x115   : > { %v2126_v49 = vpop.f32.mrb[15].mxu0  ;;  %v2129_v50 = vadd.f32 %v2051_v44, %v1267_v43  ;;  %v1268_v51 = vmul.f32 %v1815_v48, %v2046_v40  ;;  %v943_v53 = vpop.f32.mrb[15].mxu1 }
 0x116   : > { %v2135_v56 = vadd.f32 %v2051_v44, %v1265_v47  ;;  %v1266_v57 = vmul.f32 %v2046_v40, %v943_v53 }
 0x117   : > { %v2139_v61 = vadd.f32 %v2051_v44, %v1268_v51  ;;  %v1302_v51 = vadd.f32 %v2051_v44, %v1231_v29 }
 0x118   : > { %1362 = vxpose.xlu0.b32.cont [7/16] %v1298_v55, 128  ;;  %v2142_v62 = vadd.f32 %v2051_v44, %v1266_v57 }
 0x11a   : > { %v1786_v0 = vpop.f32.mrb[16].mxu0  ;;  %v1818_v2 = vpop.f32.mrb[16].mxu1 }
 0x11b   : > { %v828_v3 = vpop.f32.mrb[17].mxu0  ;;  %v1271_v4 = vmul.f32 %v1818_v2, %v2046_v40  ;;  %v956_v5 = vpop.f32.mrb[17].mxu1  ;;  %v1239_v30 = vmul.f32 %v1786_v0, %v2046_v40 }
 0x11c   : > { %v1237_v6 = vmul.f32 %v2046_v40, %v828_v3  ;;  %1363 = vxpose.xlu0.b32.cont [8/16] %v1299_v1, 128  ;;  %v1787_v7 = vpop.f32.mrb[18].mxu0  ;;  %v1269_v9 = vmul.f32 %v2046_v40, %v956_v5  ;;  %v1819_v10 = vpop.f32.mrb[18].mxu1 }
 0x11d   : > { %v831_v12 = vpop.f32.mrb[19].mxu0  ;;  %v2152_v17 = vadd.f32 %v2051_v44, %v1271_v4  ;;  %v1272_v19 = vmul.f32 %v1819_v10, %v2046_v40  ;;  %v959_v20 = vpop.f32.mrb[19].mxu1  ;;  %v1240_v63 = vmul.f32 %v1787_v7, %v2046_v40  ;;  %v1310_v0 = vadd.f32 %v2051_v44, %v1239_v30 }
 0x11e   : > { %v1238_v21 = vmul.f32 %v2046_v40, %v831_v12  ;;  %v1308_v22 = vadd.f32 %v2051_v44, %v1237_v6  ;;  %v1270_v23 = vmul.f32 %v2046_v40, %v959_v20  ;;  %v2159_v25 = vadd.f32 %v2051_v44, %v1269_v9 }
 0x11f   : > { %v2162_v26 = vadd.f32 %v2051_v44, %v1272_v19  ;;  %v1234_v6 = vmul.f32 %v2046_v40, %v2126_v49  ;;  %v1303_v7 = vadd.f32 %v2051_v44, %v1232_v18  ;;  %v1311_v9 = vadd.f32 %v2051_v44, %v1240_v63 }
 0x120   : > { %1364 = vxpose.xlu0.b32.cont [9/16] %v1300_v14, 128  ;;  %1388 = vxpose.xlu1.b32.start [1/16] %v1308_v22, 128  ;;  %v2165_v27 = vadd.f32 %v2051_v44, %v1270_v23  ;;  %v1309_v32 = vadd.f32 %v2051_v44, %v1238_v21  ;;  %v1304_v12 = vadd.f32 %v2051_v44, %v1233_v24 }
 0x121   : > { %v1236_v24 = vmul.f32 %v2123_v46, %v2046_v40 }
 0x122   : > { %v1790_v34 = vpop.f32.mrb[20].mxu0  ;;  %v1822_v37 = vpop.f32.mrb[20].mxu1 }
 0x123   : > { %v844_v39 = vpop.f32.mrb[21].mxu0  ;;  %v1275_v41 = vmul.f32 %v1822_v37, %v2046_v40  ;;  %v972_v43 = vpop.f32.mrb[21].mxu1  ;;  %v1243_v63 = vmul.f32 %v1790_v34, %v2046_v40 }
 0x124   : > { %1365 = vxpose.xlu0.b32.cont [10/16] %v1301_v31, 128  ;;  %1389 = vxpose.xlu1.b32.cont [2/16] %v1309_v32, 128  ;;  %v1791_v45 = vpop.f32.mrb[22].mxu0  ;;  %v1273_v47 = vmul.f32 %v2046_v40, %v972_v43  ;;  %v1823_v48 = vpop.f32.mrb[22].mxu1  ;;  %v1241_v4 = vmul.f32 %v2046_v40, %v844_v39 }
 0x125   : > { %v847_v53 = vpop.f32.mrb[23].mxu0  ;;  %v2178_v54 = vadd.f32 %v2051_v44, %v1275_v41  ;;  %v1276_v55 = vmul.f32 %v1823_v48, %v2046_v40  ;;  %v975_v57 = vpop.f32.mrb[23].mxu1  ;;  %v1314_v46 = vadd.f32 %v2051_v44, %v1243_v63 }
 0x126   : > { %v2184_v1 = vadd.f32 %v2051_v44, %v1273_v47  ;;  %v1274_v2 = vmul.f32 %v2046_v40, %v975_v57  ;;  %v1242_v42 = vmul.f32 %v2046_v40, %v847_v53  ;;  %v1312_v49 = vadd.f32 %v2051_v44, %v1241_v4 }
 0x127   : > { %v2190_v3 = vadd.f32 %v2051_v44, %v1276_v55  ;;  %v1235_v53 = vmul.f32 %v2117_v38, %v2046_v40  ;;  %v1305_v4 = vadd.f32 %v2051_v44, %v1234_v6 }
 0x128   : > { %1366 = vxpose.xlu0.b32.cont [11/16] %v1302_v51, 128  ;;  %1390 = vxpose.xlu1.b32.cont [3/16] %v1310_v0, 128  ;;  %v2194_v5 = vadd.f32 %v2051_v44, %v1274_v2  ;;  %v1313_v38 = vadd.f32 %v2051_v44, %v1242_v42 }
 0x129   : > { %v1306_v34 = vadd.f32 %v2051_v44, %v1235_v53 }
 0x12a   : > { %v1794_v10 = vpop.f32.mrb[24].mxu0  ;;  %v1826_v11 = vpop.f32.mrb[24].mxu1 }
 0x12b   : > { %v1247_v14 = vmul.f32 %v1794_v10, %v2046_v40  ;;  %v860_v19 = vpop.f32.mrb[25].mxu0  ;;  %v1279_v20 = vmul.f32 %v1826_v11, %v2046_v40  ;;  %v988_v21 = vpop.f32.mrb[25].mxu1  ;;  %v1244_v10 = vmul.f32 %v1791_v45, %v2046_v40 }
 0x12c   : > { %1367 = vxpose.xlu0.b32.cont [12/16] %v1303_v7, 128  ;;  %1391 = vxpose.xlu1.b32.cont [4/16] %v1311_v9, 128  ;;  %v1245_v22 = vmul.f32 %v2046_v40, %v860_v19  ;;  %v1795_v23 = vpop.f32.mrb[26].mxu0  ;;  %v1277_v29 = vmul.f32 %v2046_v40, %v988_v21  ;;  %v1827_v30 = vpop.f32.mrb[26].mxu1 }
 0x12d   : > { %v1248_v31 = vmul.f32 %v1795_v23, %v2046_v40  ;;  %v863_v32 = vpop.f32.mrb[27].mxu0  ;;  %v1318_v37 = vadd.f32 %v2051_v44, %v1247_v14  ;;  %v2210_v39 = vadd.f32 %v2051_v44, %v1279_v20  ;;  %v1280_v41 = vmul.f32 %v1827_v30, %v2046_v40  ;;  %v991_v43 = vpop.f32.mrb[27].mxu1 }
 0x12e   : > { %v1246_v47 = vmul.f32 %v2046_v40, %v863_v32  ;;  %v1316_v48 = vadd.f32 %v2051_v44, %v1245_v22  ;;  %v2216_v18 = vadd.f32 %v2051_v44, %v1277_v29  ;;  %v1278_v51 = vmul.f32 %v2046_v40, %v991_v43 }
 0x12f   : > { %v1319_v55 = vadd.f32 %v2051_v44, %v1248_v31  ;;  %v2223_v57 = vadd.f32 %v2051_v44, %v1280_v41 }
 0x130   : > { %1368 = vxpose.xlu0.b32.cont [13/16] %v1304_v12, 128  ;;  %1392 = vxpose.xlu1.b32.cont [5/16] %v1312_v49, 128  ;;  %v1317_v0 = vadd.f32 %v2051_v44, %v1246_v47  ;;  %v2228_v2 = vadd.f32 %v2051_v44, %v1278_v51 }
 0x132   : > { %v1798_v7 = vpop.f32.mrb[28].mxu0  ;;  %v1830_v9 = vpop.f32.mrb[28].mxu1 }
 0x133   : > { %v1251_v11 = vmul.f32 %v1798_v7, %v2046_v40  ;;  %v876_v12 = vpop.f32.mrb[29].mxu0  ;;  %v1283_v14 = vmul.f32 %v1830_v9, %v2046_v40  ;;  %v1004_v19 = vpop.f32.mrb[29].mxu1 }
 0x134   : > { %1369 = vxpose.xlu0.b32.cont [14/16] %v1305_v4, 128  ;;  %1393 = vxpose.xlu1.b32.cont [6/16] %v1313_v38, 128  ;;  %v1249_v6 = vmul.f32 %v2046_v40, %v876_v12  ;;  %v1799_v20 = vpop.f32.mrb[30].mxu0  ;;  %v1281_v42 = vmul.f32 %v2046_v40, %v1004_v19  ;;  %v1831_v21 = vpop.f32.mrb[30].mxu1  ;;  %v1307_v4 = vadd.f32 %v2051_v44, %v1236_v24 }
 0x135   : > { %v1252_v45 = vmul.f32 %v1799_v20, %v2046_v40  ;;  %v879_v49 = vpop.f32.mrb[31].mxu0  ;;  %v1322_v22 = vadd.f32 %v2051_v44, %v1251_v11  ;;  %v2244_v23 = vadd.f32 %v2051_v44, %v1283_v14  ;;  %v1284_v29 = vmul.f32 %v1831_v21, %v2046_v40  ;;  %v1007_v30 = vpop.f32.mrb[31].mxu1 }
 0x136   : > { %v1250_v31 = vmul.f32 %v2046_v40, %v879_v49  ;;  %v1320_v32 = vadd.f32 %v2051_v44, %v1249_v6  ;;  %v1352_v41 = vadd.f32 %v2051_v44, %v1281_v42  ;;  %v1282_v43 = vmul.f32 %v2046_v40, %v1007_v30 }
 0x137   : > { %v1323_v47 = vadd.f32 %v2051_v44, %v1252_v45  ;;  %v2253_v51 = vadd.f32 %v2051_v44, %v1284_v29  ;;  %v1315_v38 = vadd.f32 %v2051_v44, %v1244_v10 }
 0x138   : > { %1370 = vxpose.xlu0.b32.cont [15/16] %v1306_v34, 128  ;;  %1394 = vxpose.xlu1.b32.cont [7/16] %v1314_v46, 128  ;;  %v1321_v53 = vadd.f32 %v2051_v44, %v1250_v31  ;;  %v1353_v63 = vadd.f32 %v2051_v44, %v1282_v43 }
 0x13c   : > { %1371 = vxpose.xlu0.b32.end [16/16] %v1307_v4, 128  ;;  %1395 = vxpose.xlu1.b32.cont [8/16] %v1315_v38, 128 }
 0x140   : > { %1420 = vxpose.xlu0.b32.start [1/16] %v2064_v58, 128  ;;  %1396 = vxpose.xlu1.b32.cont [9/16] %v1316_v48, 128 }
 0x144   : > { %1421 = vxpose.xlu0.b32.cont [2/16] %v2070_v60, 128  ;;  %1397 = vxpose.xlu1.b32.cont [10/16] %v1317_v0, 128 }
 0x148   : > { %1422 = vxpose.xlu0.b32.cont [3/16] %v2057_v52, 128  ;;  %1398 = vxpose.xlu1.b32.cont [11/16] %v1318_v37, 128 }
 0x14c   : > { %1423 = vxpose.xlu0.b32.cont [4/16] %v2067_v59, 128  ;;  %1399 = vxpose.xlu1.b32.cont [12/16] %v1319_v55, 128 }
 0x150   : > { %1424 = vxpose.xlu0.b32.cont [5/16] %v2083_v13, 128  ;;  %1400 = vxpose.xlu1.b32.cont [13/16] %v1320_v32, 128 }
 0x154   : > { %1425 = vxpose.xlu0.b32.cont [6/16] %v2090_v16, 128  ;;  %1401 = vxpose.xlu1.b32.cont [14/16] %v1321_v53, 128 }
 0x158   : > { %1426 = vxpose.xlu0.b32.cont [7/16] %v2077_v8, 128  ;;  %1402 = vxpose.xlu1.b32.cont [15/16] %v1322_v22, 128 }
 0x15c   : > { %1427 = vxpose.xlu0.b32.cont [8/16] %v2087_v15, 128  ;;  %1403 = vxpose.xlu1.b32.end [16/16] %v1323_v47, 128 }
 0x160   : > { %1428 = vxpose.xlu0.b32.cont [9/16] %v2107_v33, 128  ;;  %1452 = vxpose.xlu1.b32.start [1/16] %v2159_v25, 128 }
 0x164   : > { %1429 = vxpose.xlu0.b32.cont [10/16] %v2114_v36, 128  ;;  %1453 = vxpose.xlu1.b32.cont [2/16] %v2165_v27, 128 }
 0x168   : > { %1430 = vxpose.xlu0.b32.cont [11/16] %v2101_v28, 128  ;;  %1454 = vxpose.xlu1.b32.cont [3/16] %v2152_v17, 128 }
 0x16c   : > { %1431 = vxpose.xlu0.b32.cont [12/16] %v2111_v35, 128  ;;  %1455 = vxpose.xlu1.b32.cont [4/16] %v2162_v26, 128 }
 0x170   : > { %1432 = vxpose.xlu0.b32.cont [13/16] %v2135_v56, 128  ;;  %1456 = vxpose.xlu1.b32.cont [5/16] %v2184_v1, 128 }
 0x174   : > { %1433 = vxpose.xlu0.b32.cont [14/16] %v2142_v62, 128  ;;  %1457 = vxpose.xlu1.b32.cont [6/16] %v2194_v5, 128 }
 0x178   : > { %1434 = vxpose.xlu0.b32.cont [15/16] %v2129_v50, 128  ;;  %1458 = vxpose.xlu1.b32.cont [7/16] %v2178_v54, 128 }
 0x17c   : > { %1435 = vxpose.xlu0.b32.end [16/16] %v2139_v61, 128  ;;  %1459 = vxpose.xlu1.b32.cont [8/16] %v2190_v3, 128 }
 0x180   : > { %1460 = vxpose.xlu1.b32.cont [9/16] %v2216_v18, 128  ;;  %v1372_v40 = vpop.trf.xlu0 }
 0x181   : > { %1484 = vst [vmem:[%s2287_s24] sm:$0xff] %v1372_v40 }
 0x184   : > { %1461 = vxpose.xlu1.b32.cont [10/16] %v2228_v2, 128  ;;  %v1373_v44 = vpop.trf.xlu0 }
 0x185   : > { %1488 = vst [vmem:[%s2287_s24 + $0x20] sm:$0xff] %v1373_v44 }
 0x188   : > { %1462 = vxpose.xlu1.b32.cont [11/16] %v2210_v39, 128  ;;  %v1374_v52 = vpop.trf.xlu0 }
 0x189   : > { %1492 = vst [vmem:[%s2287_s24 + $0x40] sm:$0xff] %v1374_v52 }
 0x18c   : > { %1463 = vxpose.xlu1.b32.cont [12/16] %v2223_v57, 128  ;;  %v1375_v58 = vpop.trf.xlu0 }
 0x18d   : > { %1496 = vst [vmem:[%s2287_s24 + $0x60] sm:$0xff] %v1375_v58 }
 0x190   : > { %1464 = vxpose.xlu1.b32.cont [13/16] %v1352_v41, 128  ;;  %v1376_v59 = vpop.trf.xlu0 }
 0x191   : > { %1500 = vst [vmem:[%s2287_s24 + $0x80] sm:$0xff] %v1376_v59 }
 0x194   : > { %1465 = vxpose.xlu1.b32.cont [14/16] %v1353_v63, 128  ;;  %v1377_v60 = vpop.trf.xlu0 }
 0x195   : > { %1504 = vst [vmem:[%s2287_s24 + $0xa0] sm:$0xff] %v1377_v60 }
 0x198   : > { %1466 = vxpose.xlu1.b32.cont [15/16] %v2244_v23, 128  ;;  %v1378_v8 = vpop.trf.xlu0 }
 0x199   : > { %1508 = vst [vmem:[%s2287_s24 + $0xc0] sm:$0xff] %v1378_v8 }
 0x19c   : > { %1467 = vxpose.xlu1.b32.end [16/16] %v2253_v51, 128  ;;  %v1379_v13 = vpop.trf.xlu0 }
 0x19d   : > { %1512 = vst [vmem:[%s2287_s24 + $0xe0] sm:$0xff] %v1379_v13 }
 0x1a0   : > { %v1404_v15 = vpop.trf.xlu1  ;;  %v1380_v16 = vpop.trf.xlu0 }
 0x1a1   : > { %1485 = vst [vmem:[%s2287_s24 + $0x8] sm:$0xff] %v1404_v15  ;;  %1516 = vst [vmem:[%s2287_s24 + $0x100] sm:$0xff] %v1380_v16 }
 0x1a4   : > { %v1405_v28 = vpop.trf.xlu1  ;;  %v1381_v33 = vpop.trf.xlu0 }
 0x1a5   : > { %1489 = vst [vmem:[%s2287_s24 + $0x28] sm:$0xff] %v1405_v28  ;;  %1520 = vst [vmem:[%s2287_s24 + $0x120] sm:$0xff] %v1381_v33 }
 0x1a8   : > { %v1406_v35 = vpop.trf.xlu1  ;;  %v1382_v36 = vpop.trf.xlu0 }
 0x1a9   : > { %1493 = vst [vmem:[%s2287_s24 + $0x48] sm:$0xff] %v1406_v35  ;;  %1524 = vst [vmem:[%s2287_s24 + $0x140] sm:$0xff] %v1382_v36 }
 0x1ac   : > { %v1407_v50 = vpop.trf.xlu1  ;;  %v1383_v56 = vpop.trf.xlu0 }
 0x1ad   : > { %1497 = vst [vmem:[%s2287_s24 + $0x68] sm:$0xff] %v1407_v50  ;;  %1528 = vst [vmem:[%s2287_s24 + $0x160] sm:$0xff] %v1383_v56 }
 0x1b0   : > { %v1408_v61 = vpop.trf.xlu1  ;;  %v1384_v62 = vpop.trf.xlu0 }
 0x1b1   : > { %1501 = vst [vmem:[%s2287_s24 + $0x88] sm:$0xff] %v1408_v61  ;;  %1532 = vst [vmem:[%s2287_s24 + $0x180] sm:$0xff] %v1384_v62 }
 0x1b4   : > { %v1409_v17 = vpop.trf.xlu1  ;;  %v1385_v25 = vpop.trf.xlu0 }
 0x1b5   : > { %1505 = vst [vmem:[%s2287_s24 + $0xa8] sm:$0xff] %v1409_v17  ;;  %1536 = vst [vmem:[%s2287_s24 + $0x1a0] sm:$0xff] %v1385_v25 }
 0x1b8   : > { %v1410_v26 = vpop.trf.xlu1  ;;  %v1386_v27 = vpop.trf.xlu0 }
 0x1b9   : > { %1509 = vst [vmem:[%s2287_s24 + $0xc8] sm:$0xff] %v1410_v26  ;;  %1540 = vst [vmem:[%s2287_s24 + $0x1c0] sm:$0xff] %v1386_v27 }
 0x1bc   : > { %v1411_v54 = vpop.trf.xlu1  ;;  %v1387_v1 = vpop.trf.xlu0 }
 0x1bd   : > { %1513 = vst [vmem:[%s2287_s24 + $0xe8] sm:$0xff] %v1411_v54  ;;  %1544 = vst [vmem:[%s2287_s24 + $0x1e0] sm:$0xff] %v1387_v1 }
 0x1c0   : > { %v1412_v3 = vpop.trf.xlu1  ;;  %v1436_v5 = vpop.trf.xlu0 }
 0x1c1   : > { %1517 = vst [vmem:[%s2287_s24 + $0x108] sm:$0xff] %v1412_v3  ;;  %1486 = vst [vmem:[%s2287_s24 + $0x10] sm:$0xff] %v1436_v5 }
 0x1c4   : > { %v1413_v37 = vpop.trf.xlu1  ;;  %v1437_v39 = vpop.trf.xlu0 }
 0x1c5   : > { %1521 = vst [vmem:[%s2287_s24 + $0x128] sm:$0xff] %v1413_v37  ;;  %1490 = vst [vmem:[%s2287_s24 + $0x30] sm:$0xff] %v1437_v39 }
 0x1c8   : > { %v1414_v48 = vpop.trf.xlu1  ;;  %v1438_v18 = vpop.trf.xlu0 }
 0x1c9   : > { %1525 = vst [vmem:[%s2287_s24 + $0x148] sm:$0xff] %v1414_v48  ;;  %1494 = vst [vmem:[%s2287_s24 + $0x50] sm:$0xff] %v1438_v18 }
 0x1cc   : > { %v1415_v55 = vpop.trf.xlu1  ;;  %v1439_v57 = vpop.trf.xlu0 }
 0x1cd   : > { %1529 = vst [vmem:[%s2287_s24 + $0x168] sm:$0xff] %v1415_v55  ;;  %1498 = vst [vmem:[%s2287_s24 + $0x70] sm:$0xff] %v1439_v57 }
 0x1d0   : > { %v1416_v0 = vpop.trf.xlu1  ;;  %v1440_v2 = vpop.trf.xlu0 }
 0x1d1   : > { %1533 = vst [vmem:[%s2287_s24 + $0x188] sm:$0xff] %v1416_v0  ;;  %1502 = vst [vmem:[%s2287_s24 + $0x90] sm:$0xff] %v1440_v2 }
 0x1d4   : > { %v1417_v24 = vpop.trf.xlu1  ;;  %v1441_v7 = vpop.trf.xlu0 }
 0x1d5   : > { %1537 = vst [vmem:[%s2287_s24 + $0x1a8] sm:$0xff] %v1417_v24  ;;  %1506 = vst [vmem:[%s2287_s24 + $0xb0] sm:$0xff] %v1441_v7 }
 0x1d8   : > { %v1418_v9 = vpop.trf.xlu1  ;;  %v1442_v10 = vpop.trf.xlu0 }
 0x1d9   : > { %1541 = vst [vmem:[%s2287_s24 + $0x1c8] sm:$0xff] %v1418_v9  ;;  %1510 = vst [vmem:[%s2287_s24 + $0xd0] sm:$0xff] %v1442_v10 }
 0x1dc   : > { %v1419_v34 = vpop.trf.xlu1  ;;  %v1443_v11 = vpop.trf.xlu0 }
 0x1dd   : > { %1545 = vst [vmem:[%s2287_s24 + $0x1e8] sm:$0xff] %v1419_v34  ;;  %1514 = vst [vmem:[%s2287_s24 + $0xf0] sm:$0xff] %v1443_v11 }
 0x1e0   : > { %v1468_v12 = vpop.trf.xlu1  ;;  %v1444_v14 = vpop.trf.xlu0 }
 0x1e1   : > { %1487 = vst [vmem:[%s2287_s24 + $0x18] sm:$0xff] %v1468_v12  ;;  %1518 = vst [vmem:[%s2287_s24 + $0x110] sm:$0xff] %v1444_v14 }
 0x1e4   : > { %v1469_v19 = vpop.trf.xlu1  ;;  %v1445_v46 = vpop.trf.xlu0 }
 0x1e5   : > { %1491 = vst [vmem:[%s2287_s24 + $0x38] sm:$0xff] %v1469_v19  ;;  %1522 = vst [vmem:[%s2287_s24 + $0x130] sm:$0xff] %v1445_v46 }
 0x1e8   : > { %v1470_v6 = vpop.trf.xlu1  ;;  %v1446_v20 = vpop.trf.xlu0 }
 0x1e9   : > { %1495 = vst [vmem:[%s2287_s24 + $0x58] sm:$0xff] %v1470_v6  ;;  %1526 = vst [vmem:[%s2287_s24 + $0x150] sm:$0xff] %v1446_v20 }
 0x1ec   : > { %v1471_v42 = vpop.trf.xlu1  ;;  %v1447_v21 = vpop.trf.xlu0 }
 0x1ed   : > { %1499 = vst [vmem:[%s2287_s24 + $0x78] sm:$0xff] %v1471_v42  ;;  %1530 = vst [vmem:[%s2287_s24 + $0x170] sm:$0xff] %v1447_v21 }
 0x1f0   : > { %v1472_v45 = vpop.trf.xlu1  ;;  %v1448_v49 = vpop.trf.xlu0 }
 0x1f1   : > { %1503 = vst [vmem:[%s2287_s24 + $0x98] sm:$0xff] %v1472_v45  ;;  %1534 = vst [vmem:[%s2287_s24 + $0x190] sm:$0xff] %v1448_v49 }
 0x1f4   : > { %v1473_v22 = vpop.trf.xlu1  ;;  %v1449_v23 = vpop.trf.xlu0 }
 0x1f5   : > { %1507 = vst [vmem:[%s2287_s24 + $0xb8] sm:$0xff] %v1473_v22  ;;  %1538 = vst [vmem:[%s2287_s24 + $0x1b0] sm:$0xff] %v1449_v23 }
 0x1f8   : > { %v1474_v29 = vpop.trf.xlu1  ;;  %v1450_v30 = vpop.trf.xlu0 }
 0x1f9   : > { %1511 = vst [vmem:[%s2287_s24 + $0xd8] sm:$0xff] %v1474_v29  ;;  %1542 = vst [vmem:[%s2287_s24 + $0x1d0] sm:$0xff] %v1450_v30 }
 0x1fc   : > { %v1475_v31 = vpop.trf.xlu1  ;;  %v1451_v32 = vpop.trf.xlu0 }
 0x1fd   : > { %1515 = vst [vmem:[%s2287_s24 + $0xf8] sm:$0xff] %v1475_v31  ;;  %1546 = vst [vmem:[%s2287_s24 + $0x1f0] sm:$0xff] %v1451_v32 }
 0x200   : > { %v1476_v41 = vpop.trf.xlu1 }
 0x201   : > { %1519 = vst [vmem:[%s2287_s24 + $0x118] sm:$0xff] %v1476_v41 }
 0x204   : > { %v1477_v43 = vpop.trf.xlu1 }
 0x205   : > { %1523 = vst [vmem:[%s2287_s24 + $0x138] sm:$0xff] %v1477_v43 }
 0x208   : > { %v1478_v47 = vpop.trf.xlu1 }
 0x209   : > { %1527 = vst [vmem:[%s2287_s24 + $0x158] sm:$0xff] %v1478_v47 }
 0x20c   : > { %v1479_v51 = vpop.trf.xlu1 }
 0x20d   : > { %1531 = vst [vmem:[%s2287_s24 + $0x178] sm:$0xff] %v1479_v51 }
 0x210   : > { %v1480_v53 = vpop.trf.xlu1 }
 0x211   : > { %1535 = vst [vmem:[%s2287_s24 + $0x198] sm:$0xff] %v1480_v53 }
 0x214   : > { %v1481_v63 = vpop.trf.xlu1 }
 0x215   : > { %1539 = vst [vmem:[%s2287_s24 + $0x1b8] sm:$0xff] %v1481_v63 }
 0x218   : > { %v1482_v4 = vpop.trf.xlu1 }
 0x219   : > { %1543 = vst [vmem:[%s2287_s24 + $0x1d8] sm:$0xff] %v1482_v4 }
 0x21c   : > { %v1483_v38 = vpop.trf.xlu1 }
 0x21d   : > { %1547 = vst [vmem:[%s2287_s24 + $0x1f8] sm:$0xff] %v1483_v38 }
 0x21e PF: > { %s14_s17 = sadd.s32 1, %s1934_s17   ;;  %s2373_s15 = smov %s1930_s16 }
 0x21f   : > { %p11_p5 = scmp.ge.s32.totalorder %s14_s17, 4   ;;  %s2374_s16 = smov %s2376_s18 }
 0x221   :  { %13 = sbr.rel (!%p11_p5) target bundleno = 2 (0x2), region = 77 }

</bundles_post_ra>
